<compile_context>
chip_gen: v6e
topology: v6e:2x2x1
jax: 0.10.0
libtpu: 0.0.40
codegen_flags: <defaults>
</compile_context>

<pallas_src>
import functools

import jax
import jax.numpy as jnp
from jax.experimental import pallas as pl
from jax.experimental.pallas import tpu as pltpu


# ------------------------------ fused kernel -------------------------------- #

def _fused_cnn_kernel(xp_ref, cw1_ref, cb1_ref, cw2_ref, cb2_ref,
                      fw1_ref, fb1_ref, fw3_ref, fb3_ref, o_ref,
                      pool1_scr, h1pad_scr, patch_scr, pool2_scr, feat_scr, fcin_scr,
                      *, nb, ih, iw):
    c1, c2 = 16, 32
    hh, hw = ih // 2, iw // 2          # spatial dims after pool1
    qh, qw = ih // 4, iw // 4          # spatial dims after pool2
    k1 = xp_ref.shape[-1]              # 9 * 3 = 27

    # ---- conv1: single matmul over pre-im2col'd patches (K=27) + bias + ReLU ----
    xp = xp_ref[...].reshape(nb * ih * iw, k1)                        # bf16
    y1 = jnp.dot(xp, cw1_ref[...], preferred_element_type=jnp.float32)
    y1 = jnp.maximum(y1 + cb1_ref[...], 0.0)                          # (nb*ih*iw, 16) f32

    # ---- pool1: 2x2 / stride-2 max pool -----------------------------------------
    y1 = y1.reshape(nb * hh, 2 * iw, c1)
    y1 = jnp.maximum(y1[:, :iw, :], y1[:, iw:, :])                    # H-pool
    pool1_scr[...] = y1.reshape(nb * hh * iw, c1)
    p1 = jnp.maximum(pool1_scr[pl.ds(0, nb * hh * hw, 2), :],         # W-pool (even/odd w)
                     pool1_scr[pl.ds(1, nb * hh * hw, 2), :])         # rows: (n, h, w)

    # ---- conv2 input with in-kernel zero halo (no XLA pad / HBM round trip) ------
    h1pad_scr[...] = jnp.zeros_like(h1pad_scr)
    h1pad_scr[:, 1:hh + 1, 1:hw + 1, :] = p1.reshape(nb, hh, hw, c1)

    # ---- conv2 im2col in VMEM: one matmul with K = 9*16 = 144 (no channel pad) ---
    for k in range(9):
        dy, dx = k // 3, k % 3
        tap = h1pad_scr[:, dy:dy + hh, dx:dx + hw, :]                 # (nb, hh, hw, 16) f32
        patch_scr[:, k * c1:(k + 1) * c1] = (
            tap.reshape(nb * hh * hw, c1).astype(jnp.bfloat16))
    y2 = jnp.dot(patch_scr[...], cw2_ref[...], preferred_element_type=jnp.float32)
    y2 = jnp.maximum(y2 + cb2_ref[...], 0.0)                          # (nb*hh*hw, 32) f32

    # ---- pool2 --------------------------------------------------------------------
    y2 = y2.reshape(nb * qh, 2 * hw, c2)
    y2 = jnp.maximum(y2[:, :hw, :], y2[:, hw:, :])
    pool2_scr[...] = y2.reshape(nb * qh * hw, c2)
    p2 = jnp.maximum(pool2_scr[pl.ds(0, nb * qh * qw, 2), :],
                     pool2_scr[pl.ds(1, nb * qh * qw, 2), :])         # (nb*qh*qw, 32)
    feat_scr[...] = p2

    # ---- flatten to a lane-dense (nb, qh*qw*32) bf16 fc input ----------------------
    # fc1 weight rows are pre-permuted to this NHWC (h, w, c) flatten order.
    npix = qh * qw
    for p in range(npix):
        fcin_scr[:, p * c2:(p + 1) * c2] = (
            feat_scr[pl.ds(p, nb, npix), :].astype(jnp.bfloat16))

    # ---- fc1 + ReLU (+ Dropout identity at inference) + fc3 + softmax --------------
    h = jnp.dot(fcin_scr[...], fw1_ref[...], preferred_element_type=jnp.float32)
    h = jnp.maximum(h + fb1_ref[...], 0.0)
    logits = jnp.dot(h.astype(jnp.bfloat16), fw3_ref[...],
                     preferred_element_type=jnp.float32) + fb3_ref[...]
    m = jnp.max(logits, axis=-1, keepdims=True)
    e = jnp.exp(logits - m)                            # padded class cols underflow to 0
    s = jnp.sum(e, axis=-1, keepdims=True)
    o_ref[...] = (e * pl.reciprocal(s, approx=True)).reshape(nb, 1, -1)


# --------------------------------- wrapper ----------------------------------- #

def fused_forward(x_patch, kp, *, nb, ih, iw):
    n = x_patch.shape[0]
    k1 = x_patch.shape[-1]
    c1, c2 = 16, 32
    hh, hw = ih // 2, iw // 2
    qh, qw = ih // 4, iw // 4
    dh = kp["fc1_w"].shape[1]          # 128 hidden
    cp = kp["fc3_w"].shape[1]          # 128 (lane-padded classes)

    kern = functools.partial(_fused_cnn_kernel, nb=nb, ih=ih, iw=iw)
    return pl.pallas_call(
        kern,
        out_shape=jax.ShapeDtypeStruct((n, 1, cp), jnp.float32),
        grid=(n // nb,),
        in_specs=[
            pl.BlockSpec((nb, ih * iw, k1), lambda i: (i, 0, 0)),    # conv1 im2col patches
            pl.BlockSpec((k1, c1), lambda i: (0, 0)),                # conv1 w (27, 16)
            pl.BlockSpec((1, c1), lambda i: (0, 0)),                 # conv1 b
            pl.BlockSpec((9 * c1, c2), lambda i: (0, 0)),            # conv2 w (144, 32)
            pl.BlockSpec((1, c2), lambda i: (0, 0)),                 # conv2 b
            pl.BlockSpec((qh * qw * c2, dh), lambda i: (0, 0)),      # fc1 w (512, 128)
            pl.BlockSpec((1, dh), lambda i: (0, 0)),                 # fc1 b
            pl.BlockSpec((dh, cp), lambda i: (0, 0)),                # fc3 w (128, 128)
            pl.BlockSpec((1, cp), lambda i: (0, 0)),                 # fc3 b
        ],
        out_specs=pl.BlockSpec((nb, 1, cp), lambda i: (i, 0, 0)),
        scratch_shapes=[
            pltpu.VMEM((nb * hh * iw, c1), jnp.float32),             # pool1 W-pool scratch
            pltpu.VMEM((nb, hh + 2, hw + 2, c1), jnp.float32),       # conv2 input w/ zero halo
            pltpu.VMEM((nb * hh * hw, 9 * c1), jnp.bfloat16),        # conv2 im2col (K=144)
            pltpu.VMEM((nb * qh * hw, c2), jnp.float32),             # pool2 W-pool scratch
            pltpu.VMEM((nb * qh * qw, c2), jnp.float32),             # pooled features
            pltpu.VMEM((nb, qh * qw * c2), jnp.bfloat16),            # fc1 input (lane-dense)
        ],
        compiler_params=pltpu.CompilerParams(
            dimension_semantics=("parallel",),
            vmem_limit_bytes=32 * 1024 * 1024,
        ),
    )(x_patch, kp["conv1_w"], kp["conv1_b"], kp["conv2_w"], kp["conv2_b"],
      kp["fc1_w"], kp["fc1_b"], kp["fc3_w"], kp["fc3_b"])


def simple_cnn_forward(x_nchw, kp, num_classes):
    n, cin, ih, iw = x_nchw.shape
    assert cin == 3, "SimpleCNN expects 3 input channels"
    assert ih % 4 == 0 and iw % 4 == 0, "two 2x2 pools require H, W divisible by 4"

    # samples per grid step: biggest of (8,4,2) dividing N while keeping >=2 grid steps
    nb = 1
    for cand in (8, 4, 2):
        if n % cand == 0 and n // cand >= 2:
            nb = cand
            break

    # conv1 im2col (K = 9*3 = 27) done once in the wrapper; bf16 MXU operand.
    x = jnp.transpose(x_nchw, (0, 2, 3, 1)).astype(jnp.float32)       # NCHW -> NHWC
    xpad = jnp.pad(x, ((0, 0), (1, 1), (1, 1), (0, 0)))
    taps = [xpad[:, dy:dy + ih, dx:dx + iw, :] for dy in range(3) for dx in range(3)]
    x_patch = (jnp.concatenate(taps, axis=-1)
               .reshape(n, ih * iw, 9 * cin).astype(jnp.bfloat16))

    out = fused_forward(x_patch, kp, nb=nb, ih=ih, iw=iw)
    return out.reshape(n, -1)[:, :num_classes]


# --------------------------- parameter preparation --------------------------- #

def init_torch_like_params(img_width, img_height, num_classes=2, seed=0):
    """Parameters in the PyTorch module's native shapes."""
    key = jax.random.PRNGKey(seed)
    ks = jax.random.split(key, 8)
    size_fc1 = 32 * (img_height // 4) * (img_width // 4)
    return {
        "conv1_w": 0.1 * jax.random.normal(ks[0], (16, 3, 3, 3), jnp.float32),
        "conv1_b": 0.01 * jax.random.normal(ks[1], (16,), jnp.float32),
        "conv2_w": 0.1 * jax.random.normal(ks[2], (32, 16, 3, 3), jnp.float32),
        "conv2_b": 0.01 * jax.random.normal(ks[3], (32,), jnp.float32),
        "fc1_w": 0.05 * jax.random.normal(ks[4], (128, size_fc1), jnp.float32),
        "fc1_b": 0.01 * jax.random.normal(ks[5], (128,), jnp.float32),
        "fc3_w": 0.05 * jax.random.normal(ks[6], (num_classes, 128), jnp.float32),
        "fc3_b": 0.01 * jax.random.normal(ks[7], (num_classes,), jnp.float32),
    }


def prepare_params(tp, img_width, img_height, num_classes):
    """One-time conversion to kernel-friendly layouts (no channel padding, bf16 operands)."""
    qh, qw = img_height // 4, img_width // 4

    def conv_w(w_oihw):
        cout, cin, kh, kw = w_oihw.shape
        # (cout, cin, kh, kw) -> rows ordered (ky, kx, cin): matches the im2col column order
        w = jnp.transpose(w_oihw, (2, 3, 1, 0)).reshape(kh * kw * cin, cout)
        return w.astype(jnp.bfloat16)

    # fc1: (out=128, in=32*qh*qw) with NCHW flatten -> rows reordered to NHWC (h, w, c)
    w1 = tp["fc1_w"].reshape(128, 32, qh, qw)
    w1 = jnp.transpose(w1, (2, 3, 1, 0)).reshape(qh * qw * 32, 128).astype(jnp.bfloat16)

    nc = num_classes
    w3 = jnp.pad(tp["fc3_w"].T, ((0, 0), (0, 128 - nc))).astype(jnp.bfloat16)
    b3 = jnp.concatenate(
        [tp["fc3_b"].astype(jnp.float32),
         jnp.full((128 - nc,), -1e30, jnp.float32)]).reshape(1, 128)

    return {
        "conv1_w": conv_w(tp["conv1_w"]),                               # (27, 16)  bf16
        "conv1_b": tp["conv1_b"].astype(jnp.float32).reshape(1, 16),
        "conv2_w": conv_w(tp["conv2_w"]),                               # (144, 32) bf16
        "conv2_b": tp["conv2_b"].astype(jnp.float32).reshape(1, 32),
        "fc1_w": w1,                                                    # (512, 128) bf16
        "fc1_b": tp["fc1_b"].astype(jnp.float32).reshape(1, 128),
        "fc3_w": w3,                                                    # (128, 128) bf16
        "fc3_b": b3,                                                    # (1, 128)   f32
    }


# ------------------------- pure-JAX reference (f32) -------------------------- #

def reference_forward(x_nchw, tp):
    x = jnp.transpose(x_nchw, (0, 2, 3, 1)).astype(jnp.float32)

    def conv(x, w, b):
        return jax.lax.conv_general_dilated(
            x, jnp.transpose(w, (2, 3, 1, 0)), (1, 1), "SAME",
            dimension_numbers=("NHWC", "HWIO", "NHWC")) + b

    def pool(x):
        return jax.lax.reduce_window(x, -jnp.inf, jax.lax.max,
                                     (1, 2, 2, 1), (1, 2, 2, 1), "VALID")

    x = pool(jax.nn.relu(conv(x, tp["conv1_w"], tp["conv1_b"])))
    x = pool(jax.nn.relu(conv(x, tp["conv2_w"], tp["conv2_b"])))
    n = x.shape[0]
    x = jnp.transpose(x, (0, 3, 1, 2)).reshape(n, -1)                  # NCHW flatten
    x = jax.nn.relu(x @ tp["fc1_w"].T + tp["fc1_b"])
    logits = x @ tp["fc3_w"].T + tp["fc3_b"]
    return jax.nn.softmax(logits, axis=1)


if __name__ == "__main__":
    batch, img_h, img_w, num_classes = 2, 16, 16, 2
    key = jax.random.PRNGKey(0)
    x = jax.random.normal(key, (batch, 3, img_h, img_w), jnp.float32)

    torch_params = init_torch_like_params(img_w, img_h, num_classes, seed=0)
    kparams = prepare_params(torch_params, img_w, img_h, num_classes)

    fwd = jax.jit(functools.partial(simple_cnn_forward, num_classes=num_classes))
    out = jax.block_until_ready(fwd(x, kparams))

    assert out.shape == (batch, num_classes)
    # approx EUP reciprocal in the softmax epilogue -> slightly looser sum-to-1 check
    assert bool(jnp.allclose(jnp.sum(out, axis=1), 1.0, atol=2e-2))

    ref = jax.block_until_ready(jax.jit(reference_forward)(x, torch_params))
    assert bool(jnp.allclose(out, ref, atol=3e-2)), (out, ref)         # bf16-operand tolerance

    print("KERNEL_OK")
</pallas_src>

<mosaic_0001>
module attributes {stable_mosaic.version = 11 : i64} {
  func.func @_fused_cnn_kernel(%arg0: i32, %arg1: memref<1x256x27xbf16, #tpu.memory_space<vmem>>, %arg2: memref<27x16xbf16, #tpu.memory_space<vmem>>, %arg3: memref<1x16xf32, #tpu.memory_space<vmem>>, %arg4: memref<144x32xbf16, #tpu.memory_space<vmem>>, %arg5: memref<1x32xf32, #tpu.memory_space<vmem>>, %arg6: memref<512x128xbf16, #tpu.memory_space<vmem>>, %arg7: memref<1x128xf32, #tpu.memory_space<vmem>>, %arg8: memref<128x128xbf16, #tpu.memory_space<vmem>>, %arg9: memref<1x128xf32, #tpu.memory_space<vmem>>, %arg10: memref<1x1x128xf32, #tpu.memory_space<vmem>>, %arg11: memref<128x16xf32, #tpu.memory_space<vmem>>, %arg12: memref<1x10x10x16xf32, #tpu.memory_space<vmem>>, %arg13: memref<64x144xbf16, #tpu.memory_space<vmem>>, %arg14: memref<32x32xf32, #tpu.memory_space<vmem>>, %arg15: memref<16x32xf32, #tpu.memory_space<vmem>>, %arg16: memref<1x512xbf16, #tpu.memory_space<vmem>>) attributes {dimension_semantics = [#tpu.dimension_semantics<parallel>], iteration_bounds = array<i64: 2>, scalar_prefetch = 0 : i64, scratch_operands = 6 : i64, tpu.core_type = #tpu.core_type<tc>, window_params = [{transform_indices = @transform_0, window_bounds = array<i64: 1, 256, 27>}, {pipeline_mode = #tpu.pipeline_mode<synchronous>, transform_indices = @transform_1, window_bounds = array<i64: 27, 16>}, {pipeline_mode = #tpu.pipeline_mode<synchronous>, transform_indices = @transform_2, window_bounds = array<i64: 1, 16>}, {pipeline_mode = #tpu.pipeline_mode<synchronous>, transform_indices = @transform_3, window_bounds = array<i64: 144, 32>}, {pipeline_mode = #tpu.pipeline_mode<synchronous>, transform_indices = @transform_4, window_bounds = array<i64: 1, 32>}, {pipeline_mode = #tpu.pipeline_mode<synchronous>, transform_indices = @transform_5, window_bounds = array<i64: 512, 128>}, {pipeline_mode = #tpu.pipeline_mode<synchronous>, transform_indices = @transform_6, window_bounds = array<i64: 1, 128>}, {pipeline_mode = #tpu.pipeline_mode<synchronous>, transform_indices = @transform_7, window_bounds = array<i64: 128, 128>}, {pipeline_mode = #tpu.pipeline_mode<synchronous>, transform_indices = @transform_8, window_bounds = array<i64: 1, 128>}, {transform_indices = @transform_9, window_bounds = array<i64: 1, 1, 128>}]} {
    %c0 = arith.constant 0 : index
    %c0_0 = arith.constant 0 : index
    %c0_1 = arith.constant 0 : index
    %0 = vector.load %arg1[%c0, %c0_0, %c0_1] : memref<1x256x27xbf16, #tpu.memory_space<vmem>>, vector<1x256x27xbf16>
    %1 = vector.shape_cast %0 : vector<1x256x27xbf16> to vector<256x27xbf16>
    %c0_2 = arith.constant 0 : index
    %c0_3 = arith.constant 0 : index
    %2 = vector.load %arg2[%c0_2, %c0_3] : memref<27x16xbf16, #tpu.memory_space<vmem>>, vector<27x16xbf16>
    %cst = arith.constant dense<0.000000e+00> : vector<256x16xf32>
    %3 = tpu.matmul %1, %2, %cst {dimension_numbers = #tpu.dot_dimension_numbers<[1], [0], [0], [1], [0, 0, 1, 1], [], []>} : vector<256x27xbf16>, vector<27x16xbf16>, vector<256x16xf32> -> vector<256x16xf32>
    %c0_4 = arith.constant 0 : index
    %c0_5 = arith.constant 0 : index
    %4 = vector.load %arg3[%c0_4, %c0_5] : memref<1x16xf32, #tpu.memory_space<vmem>>, vector<1x16xf32>
    %5 = vector.broadcast %4 : vector<1x16xf32> to vector<256x16xf32>
    %6 = arith.addf %3, %5 : vector<256x16xf32>
    %cst_6 = arith.constant 0.000000e+00 : f32
    %7 = vector.broadcast %cst_6 : f32 to vector<256x16xf32>
    %8 = arith.maximumf %6, %7 : vector<256x16xf32>
    %9 = vector.shape_cast %8 : vector<256x16xf32> to vector<8x32x16xf32>
    %10 = vector.extract_strided_slice %9 {offsets = [0, 0, 0], sizes = [8, 16, 16], strides = [1, 1, 1]} : vector<8x32x16xf32> to vector<8x16x16xf32>
    %11 = vector.extract_strided_slice %9 {offsets = [0, 16, 0], sizes = [8, 16, 16], strides = [1, 1, 1]} : vector<8x32x16xf32> to vector<8x16x16xf32>
    %12 = arith.maximumf %10, %11 : vector<8x16x16xf32>
    %13 = vector.shape_cast %12 : vector<8x16x16xf32> to vector<128x16xf32>
    %c0_7 = arith.constant 0 : index
    %c0_8 = arith.constant 0 : index
    %14 = vector.load %arg11[%c0_7, %c0_8] : memref<128x16xf32, #tpu.memory_space<vmem>>, vector<128x16xf32>
    tpu.vector_store %arg11[%c0_7, %c0_8], %13 {strides = array<i32>} : memref<128x16xf32, #tpu.memory_space<vmem>>, vector<128x16xf32>,
    %c0_9 = arith.constant 0 : index
    %c0_10 = arith.constant 0 : index
    %15 = tpu.strided_load %arg11[%c0_9, %c0_10] {strides = array<i32: 2, 1>} : memref<128x16xf32, #tpu.memory_space<vmem>>, vector<64x16xf32>
    %c1 = arith.constant 1 : index
    %c0_11 = arith.constant 0 : index
    %16 = tpu.strided_load %arg11[%c1, %c0_11] {strides = array<i32: 2, 1>} : memref<128x16xf32, #tpu.memory_space<vmem>>, vector<64x16xf32>
    %17 = arith.maximumf %15, %16 : vector<64x16xf32>
    %cst_12 = arith.constant 0.000000e+00 : f32
    %18 = vector.broadcast %cst_12 : f32 to vector<1x10x10x16xf32>
    %c0_13 = arith.constant 0 : index
    %c0_14 = arith.constant 0 : index
    %c0_15 = arith.constant 0 : index
    %c0_16 = arith.constant 0 : index
    %19 = vector.load %arg12[%c0_13, %c0_14, %c0_15, %c0_16] : memref<1x10x10x16xf32, #tpu.memory_space<vmem>>, vector<1x10x10x16xf32>
    tpu.vector_store %arg12[%c0_13, %c0_14, %c0_15, %c0_16], %18 {strides = array<i32>} : memref<1x10x10x16xf32, #tpu.memory_space<vmem>>, vector<1x10x10x16xf32>,
    %20 = vector.shape_cast %17 : vector<64x16xf32> to vector<1x8x8x16xf32>
    %c0_17 = arith.constant 0 : index
    %c1_18 = arith.constant 1 : index
    %c1_19 = arith.constant 1 : index
    %c0_20 = arith.constant 0 : index
    %21 = vector.load %arg12[%c0_17, %c1_18, %c1_19, %c0_20] : memref<1x10x10x16xf32, #tpu.memory_space<vmem>>, vector<1x8x8x16xf32>
    tpu.vector_store %arg12[%c0_17, %c1_18, %c1_19, %c0_20], %20 {strides = array<i32>} : memref<1x10x10x16xf32, #tpu.memory_space<vmem>>, vector<1x8x8x16xf32>,
    %c0_21 = arith.constant 0 : index
    %c0_22 = arith.constant 0 : index
    %c0_23 = arith.constant 0 : index
    %c0_24 = arith.constant 0 : index
    %22 = vector.load %arg12[%c0_21, %c0_22, %c0_23, %c0_24] : memref<1x10x10x16xf32, #tpu.memory_space<vmem>>, vector<1x8x8x16xf32>
    %23 = vector.shape_cast %22 : vector<1x8x8x16xf32> to vector<64x16xf32>
    %24 = arith.truncf %23 : vector<64x16xf32> to vector<64x16xbf16>
    %c0_25 = arith.constant 0 : index
    %c0_26 = arith.constant 0 : index
    %25 = vector.load %arg13[%c0_25, %c0_26] : memref<64x144xbf16, #tpu.memory_space<vmem>>, vector<64x16xbf16>
    tpu.vector_store %arg13[%c0_25, %c0_26], %24 {strides = array<i32>} : memref<64x144xbf16, #tpu.memory_space<vmem>>, vector<64x16xbf16>,
    %c0_27 = arith.constant 0 : index
    %c0_28 = arith.constant 0 : index
    %c1_29 = arith.constant 1 : index
    %c0_30 = arith.constant 0 : index
    %26 = vector.load %arg12[%c0_27, %c0_28, %c1_29, %c0_30] : memref<1x10x10x16xf32, #tpu.memory_space<vmem>>, vector<1x8x8x16xf32>
    %27 = vector.shape_cast %26 : vector<1x8x8x16xf32> to vector<64x16xf32>
    %28 = arith.truncf %27 : vector<64x16xf32> to vector<64x16xbf16>
    %c0_31 = arith.constant 0 : index
    %c16 = arith.constant 16 : index
    %29 = vector.load %arg13[%c0_31, %c16] : memref<64x144xbf16, #tpu.memory_space<vmem>>, vector<64x16xbf16>
    tpu.vector_store %arg13[%c0_31, %c16], %28 {strides = array<i32>} : memref<64x144xbf16, #tpu.memory_space<vmem>>, vector<64x16xbf16>,
    %c0_32 = arith.constant 0 : index
    %c0_33 = arith.constant 0 : index
    %c2 = arith.constant 2 : index
    %c0_34 = arith.constant 0 : index
    %30 = vector.load %arg12[%c0_32, %c0_33, %c2, %c0_34] : memref<1x10x10x16xf32, #tpu.memory_space<vmem>>, vector<1x8x8x16xf32>
    %31 = vector.shape_cast %30 : vector<1x8x8x16xf32> to vector<64x16xf32>
    %32 = arith.truncf %31 : vector<64x16xf32> to vector<64x16xbf16>
    %c0_35 = arith.constant 0 : index
    %c32 = arith.constant 32 : index
    %33 = vector.load %arg13[%c0_35, %c32] : memref<64x144xbf16, #tpu.memory_space<vmem>>, vector<64x16xbf16>
    tpu.vector_store %arg13[%c0_35, %c32], %32 {strides = array<i32>} : memref<64x144xbf16, #tpu.memory_space<vmem>>, vector<64x16xbf16>,
    %c0_36 = arith.constant 0 : index
    %c1_37 = arith.constant 1 : index
    %c0_38 = arith.constant 0 : index
    %c0_39 = arith.constant 0 : index
    %34 = vector.load %arg12[%c0_36, %c1_37, %c0_38, %c0_39] : memref<1x10x10x16xf32, #tpu.memory_space<vmem>>, vector<1x8x8x16xf32>
    %35 = vector.shape_cast %34 : vector<1x8x8x16xf32> to vector<64x16xf32>
    %36 = arith.truncf %35 : vector<64x16xf32> to vector<64x16xbf16>
    %c0_40 = arith.constant 0 : index
    %c48 = arith.constant 48 : index
    %37 = vector.load %arg13[%c0_40, %c48] : memref<64x144xbf16, #tpu.memory_space<vmem>>, vector<64x16xbf16>
    tpu.vector_store %arg13[%c0_40, %c48], %36 {strides = array<i32>} : memref<64x144xbf16, #tpu.memory_space<vmem>>, vector<64x16xbf16>,
    %c0_41 = arith.constant 0 : index
    %c1_42 = arith.constant 1 : index
    %c1_43 = arith.constant 1 : index
    %c0_44 = arith.constant 0 : index
    %38 = vector.load %arg12[%c0_41, %c1_42, %c1_43, %c0_44] : memref<1x10x10x16xf32, #tpu.memory_space<vmem>>, vector<1x8x8x16xf32>
    %39 = vector.shape_cast %38 : vector<1x8x8x16xf32> to vector<64x16xf32>
    %40 = arith.truncf %39 : vector<64x16xf32> to vector<64x16xbf16>
    %c0_45 = arith.constant 0 : index
    %c64 = arith.constant 64 : index
    %41 = vector.load %arg13[%c0_45, %c64] : memref<64x144xbf16, #tpu.memory_space<vmem>>, vector<64x16xbf16>
    tpu.vector_store %arg13[%c0_45, %c64], %40 {strides = array<i32>} : memref<64x144xbf16, #tpu.memory_space<vmem>>, vector<64x16xbf16>,
    %c0_46 = arith.constant 0 : index
    %c1_47 = arith.constant 1 : index
    %c2_48 = arith.constant 2 : index
    %c0_49 = arith.constant 0 : index
    %42 = vector.load %arg12[%c0_46, %c1_47, %c2_48, %c0_49] : memref<1x10x10x16xf32, #tpu.memory_space<vmem>>, vector<1x8x8x16xf32>
    %43 = vector.shape_cast %42 : vector<1x8x8x16xf32> to vector<64x16xf32>
    %44 = arith.truncf %43 : vector<64x16xf32> to vector<64x16xbf16>
    %c0_50 = arith.constant 0 : index
    %c80 = arith.constant 80 : index
    %45 = vector.load %arg13[%c0_50, %c80] : memref<64x144xbf16, #tpu.memory_space<vmem>>, vector<64x16xbf16>
    tpu.vector_store %arg13[%c0_50, %c80], %44 {strides = array<i32>} : memref<64x144xbf16, #tpu.memory_space<vmem>>, vector<64x16xbf16>,
    %c0_51 = arith.constant 0 : index
    %c2_52 = arith.constant 2 : index
    %c0_53 = arith.constant 0 : index
    %c0_54 = arith.constant 0 : index
    %46 = vector.load %arg12[%c0_51, %c2_52, %c0_53, %c0_54] : memref<1x10x10x16xf32, #tpu.memory_space<vmem>>, vector<1x8x8x16xf32>
    %47 = vector.shape_cast %46 : vector<1x8x8x16xf32> to vector<64x16xf32>
    %48 = arith.truncf %47 : vector<64x16xf32> to vector<64x16xbf16>
    %c0_55 = arith.constant 0 : index
    %c96 = arith.constant 96 : index
    %49 = vector.load %arg13[%c0_55, %c96] : memref<64x144xbf16, #tpu.memory_space<vmem>>, vector<64x16xbf16>
    tpu.vector_store %arg13[%c0_55, %c96], %48 {strides = array<i32>} : memref<64x144xbf16, #tpu.memory_space<vmem>>, vector<64x16xbf16>,
    %c0_56 = arith.constant 0 : index
    %c2_57 = arith.constant 2 : index
    %c1_58 = arith.constant 1 : index
    %c0_59 = arith.constant 0 : index
    %50 = vector.load %arg12[%c0_56, %c2_57, %c1_58, %c0_59] : memref<1x10x10x16xf32, #tpu.memory_space<vmem>>, vector<1x8x8x16xf32>
    %51 = vector.shape_cast %50 : vector<1x8x8x16xf32> to vector<64x16xf32>
    %52 = arith.truncf %51 : vector<64x16xf32> to vector<64x16xbf16>
    %c0_60 = arith.constant 0 : index
    %c112 = arith.constant 112 : index
    %53 = vector.load %arg13[%c0_60, %c112] : memref<64x144xbf16, #tpu.memory_space<vmem>>, vector<64x16xbf16>
    tpu.vector_store %arg13[%c0_60, %c112], %52 {strides = array<i32>} : memref<64x144xbf16, #tpu.memory_space<vmem>>, vector<64x16xbf16>,
    %c0_61 = arith.constant 0 : index
    %c2_62 = arith.constant 2 : index
    %c2_63 = arith.constant 2 : index
    %c0_64 = arith.constant 0 : index
    %54 = vector.load %arg12[%c0_61, %c2_62, %c2_63, %c0_64] : memref<1x10x10x16xf32, #tpu.memory_space<vmem>>, vector<1x8x8x16xf32>
    %55 = vector.shape_cast %54 : vector<1x8x8x16xf32> to vector<64x16xf32>
    %56 = arith.truncf %55 : vector<64x16xf32> to vector<64x16xbf16>
    %c0_65 = arith.constant 0 : index
    %c128 = arith.constant 128 : index
    %57 = vector.load %arg13[%c0_65, %c128] : memref<64x144xbf16, #tpu.memory_space<vmem>>, vector<64x16xbf16>
    tpu.vector_store %arg13[%c0_65, %c128], %56 {strides = array<i32>} : memref<64x144xbf16, #tpu.memory_space<vmem>>, vector<64x16xbf16>,
    %c0_66 = arith.constant 0 : index
    %c0_67 = arith.constant 0 : index
    %58 = vector.load %arg13[%c0_66, %c0_67] : memref<64x144xbf16, #tpu.memory_space<vmem>>, vector<64x144xbf16>
    %c0_68 = arith.constant 0 : index
    %c0_69 = arith.constant 0 : index
    %59 = vector.load %arg4[%c0_68, %c0_69] : memref<144x32xbf16, #tpu.memory_space<vmem>>, vector<144x32xbf16>
    %cst_70 = arith.constant dense<0.000000e+00> : vector<64x32xf32>
    %60 = tpu.matmul %58, %59, %cst_70 {dimension_numbers = #tpu.dot_dimension_numbers<[1], [0], [0], [1], [0, 0, 1, 1], [], []>} : vector<64x144xbf16>, vector<144x32xbf16>, vector<64x32xf32> -> vector<64x32xf32>
    %c0_71 = arith.constant 0 : index
    %c0_72 = arith.constant 0 : index
    %61 = vector.load %arg5[%c0_71, %c0_72] : memref<1x32xf32, #tpu.memory_space<vmem>>, vector<1x32xf32>
    %62 = vector.broadcast %61 : vector<1x32xf32> to vector<64x32xf32>
    %63 = arith.addf %60, %62 : vector<64x32xf32>
    %cst_73 = arith.constant 0.000000e+00 : f32
    %64 = vector.broadcast %cst_73 : f32 to vector<64x32xf32>
    %65 = arith.maximumf %63, %64 : vector<64x32xf32>
    %66 = vector.shape_cast %65 : vector<64x32xf32> to vector<4x16x32xf32>
    %67 = vector.extract_strided_slice %66 {offsets = [0, 0, 0], sizes = [4, 8, 32], strides = [1, 1, 1]} : vector<4x16x32xf32> to vector<4x8x32xf32>
    %68 = vector.extract_strided_slice %66 {offsets = [0, 8, 0], sizes = [4, 8, 32], strides = [1, 1, 1]} : vector<4x16x32xf32> to vector<4x8x32xf32>
    %69 = arith.maximumf %67, %68 : vector<4x8x32xf32>
    %70 = vector.shape_cast %69 : vector<4x8x32xf32> to vector<32x32xf32>
    %c0_74 = arith.constant 0 : index
    %c0_75 = arith.constant 0 : index
    %71 = vector.load %arg14[%c0_74, %c0_75] : memref<32x32xf32, #tpu.memory_space<vmem>>, vector<32x32xf32>
    tpu.vector_store %arg14[%c0_74, %c0_75], %70 {strides = array<i32>} : memref<32x32xf32, #tpu.memory_space<vmem>>, vector<32x32xf32>,
    %c0_76 = arith.constant 0 : index
    %c0_77 = arith.constant 0 : index
    %72 = tpu.strided_load %arg14[%c0_76, %c0_77] {strides = array<i32: 2, 1>} : memref<32x32xf32, #tpu.memory_space<vmem>>, vector<16x32xf32>
    %c1_78 = arith.constant 1 : index
    %c0_79 = arith.constant 0 : index
    %73 = tpu.strided_load %arg14[%c1_78, %c0_79] {strides = array<i32: 2, 1>} : memref<32x32xf32, #tpu.memory_space<vmem>>, vector<16x32xf32>
    %74 = arith.maximumf %72, %73 : vector<16x32xf32>
    %c0_80 = arith.constant 0 : index
    %c0_81 = arith.constant 0 : index
    %75 = vector.load %arg15[%c0_80, %c0_81] : memref<16x32xf32, #tpu.memory_space<vmem>>, vector<16x32xf32>
    tpu.vector_store %arg15[%c0_80, %c0_81], %74 {strides = array<i32>} : memref<16x32xf32, #tpu.memory_space<vmem>>, vector<16x32xf32>,
    %c0_82 = arith.constant 0 : index
    %c0_83 = arith.constant 0 : index
    %76 = tpu.strided_load %arg15[%c0_82, %c0_83] {strides = array<i32: 16, 1>} : memref<16x32xf32, #tpu.memory_space<vmem>>, vector<1x32xf32>
    %77 = arith.truncf %76 : vector<1x32xf32> to vector<1x32xbf16>
    %c0_84 = arith.constant 0 : index
    %c0_85 = arith.constant 0 : index
    %78 = vector.load %arg16[%c0_84, %c0_85] : memref<1x512xbf16, #tpu.memory_space<vmem>>, vector<1x32xbf16>
    tpu.vector_store %arg16[%c0_84, %c0_85], %77 {strides = array<i32>} : memref<1x512xbf16, #tpu.memory_space<vmem>>, vector<1x32xbf16>,
    %c1_86 = arith.constant 1 : index
    %c0_87 = arith.constant 0 : index
    %79 = tpu.strided_load %arg15[%c1_86, %c0_87] {strides = array<i32: 16, 1>} : memref<16x32xf32, #tpu.memory_space<vmem>>, vector<1x32xf32>
    %80 = arith.truncf %79 : vector<1x32xf32> to vector<1x32xbf16>
    %c0_88 = arith.constant 0 : index
    %c32_89 = arith.constant 32 : index
    %81 = vector.load %arg16[%c0_88, %c32_89] : memref<1x512xbf16, #tpu.memory_space<vmem>>, vector<1x32xbf16>
    tpu.vector_store %arg16[%c0_88, %c32_89], %80 {strides = array<i32>} : memref<1x512xbf16, #tpu.memory_space<vmem>>, vector<1x32xbf16>,
    %c2_90 = arith.constant 2 : index
    %c0_91 = arith.constant 0 : index
    %82 = tpu.strided_load %arg15[%c2_90, %c0_91] {strides = array<i32: 16, 1>} : memref<16x32xf32, #tpu.memory_space<vmem>>, vector<1x32xf32>
    %83 = arith.truncf %82 : vector<1x32xf32> to vector<1x32xbf16>
    %c0_92 = arith.constant 0 : index
    %c64_93 = arith.constant 64 : index
    %84 = vector.load %arg16[%c0_92, %c64_93] : memref<1x512xbf16, #tpu.memory_space<vmem>>, vector<1x32xbf16>
    tpu.vector_store %arg16[%c0_92, %c64_93], %83 {strides = array<i32>} : memref<1x512xbf16, #tpu.memory_space<vmem>>, vector<1x32xbf16>,
    %c3 = arith.constant 3 : index
    %c0_94 = arith.constant 0 : index
    %85 = tpu.strided_load %arg15[%c3, %c0_94] {strides = array<i32: 16, 1>} : memref<16x32xf32, #tpu.memory_space<vmem>>, vector<1x32xf32>
    %86 = arith.truncf %85 : vector<1x32xf32> to vector<1x32xbf16>
    %c0_95 = arith.constant 0 : index
    %c96_96 = arith.constant 96 : index
    %87 = vector.load %arg16[%c0_95, %c96_96] : memref<1x512xbf16, #tpu.memory_space<vmem>>, vector<1x32xbf16>
    tpu.vector_store %arg16[%c0_95, %c96_96], %86 {strides = array<i32>} : memref<1x512xbf16, #tpu.memory_space<vmem>>, vector<1x32xbf16>,
    %c4 = arith.constant 4 : index
    %c0_97 = arith.constant 0 : index
    %88 = tpu.strided_load %arg15[%c4, %c0_97] {strides = array<i32: 16, 1>} : memref<16x32xf32, #tpu.memory_space<vmem>>, vector<1x32xf32>
    %89 = arith.truncf %88 : vector<1x32xf32> to vector<1x32xbf16>
    %c0_98 = arith.constant 0 : index
    %c128_99 = arith.constant 128 : index
    %90 = vector.load %arg16[%c0_98, %c128_99] : memref<1x512xbf16, #tpu.memory_space<vmem>>, vector<1x32xbf16>
    tpu.vector_store %arg16[%c0_98, %c128_99], %89 {strides = array<i32>} : memref<1x512xbf16, #tpu.memory_space<vmem>>, vector<1x32xbf16>,
    %c5 = arith.constant 5 : index
    %c0_100 = arith.constant 0 : index
    %91 = tpu.strided_load %arg15[%c5, %c0_100] {strides = array<i32: 16, 1>} : memref<16x32xf32, #tpu.memory_space<vmem>>, vector<1x32xf32>
    %92 = arith.truncf %91 : vector<1x32xf32> to vector<1x32xbf16>
    %c0_101 = arith.constant 0 : index
    %c160 = arith.constant 160 : index
    %93 = vector.load %arg16[%c0_101, %c160] : memref<1x512xbf16, #tpu.memory_space<vmem>>, vector<1x32xbf16>
    tpu.vector_store %arg16[%c0_101, %c160], %92 {strides = array<i32>} : memref<1x512xbf16, #tpu.memory_space<vmem>>, vector<1x32xbf16>,
    %c6 = arith.constant 6 : index
    %c0_102 = arith.constant 0 : index
    %94 = tpu.strided_load %arg15[%c6, %c0_102] {strides = array<i32: 16, 1>} : memref<16x32xf32, #tpu.memory_space<vmem>>, vector<1x32xf32>
    %95 = arith.truncf %94 : vector<1x32xf32> to vector<1x32xbf16>
    %c0_103 = arith.constant 0 : index
    %c192 = arith.constant 192 : index
    %96 = vector.load %arg16[%c0_103, %c192] : memref<1x512xbf16, #tpu.memory_space<vmem>>, vector<1x32xbf16>
    tpu.vector_store %arg16[%c0_103, %c192], %95 {strides = array<i32>} : memref<1x512xbf16, #tpu.memory_space<vmem>>, vector<1x32xbf16>,
    %c7 = arith.constant 7 : index
    %c0_104 = arith.constant 0 : index
    %97 = tpu.strided_load %arg15[%c7, %c0_104] {strides = array<i32: 16, 1>} : memref<16x32xf32, #tpu.memory_space<vmem>>, vector<1x32xf32>
    %98 = arith.truncf %97 : vector<1x32xf32> to vector<1x32xbf16>
    %c0_105 = arith.constant 0 : index
    %c224 = arith.constant 224 : index
    %99 = vector.load %arg16[%c0_105, %c224] : memref<1x512xbf16, #tpu.memory_space<vmem>>, vector<1x32xbf16>
    tpu.vector_store %arg16[%c0_105, %c224], %98 {strides = array<i32>} : memref<1x512xbf16, #tpu.memory_space<vmem>>, vector<1x32xbf16>,
    %c8 = arith.constant 8 : index
    %c0_106 = arith.constant 0 : index
    %100 = tpu.strided_load %arg15[%c8, %c0_106] {strides = array<i32: 16, 1>} : memref<16x32xf32, #tpu.memory_space<vmem>>, vector<1x32xf32>
    %101 = arith.truncf %100 : vector<1x32xf32> to vector<1x32xbf16>
    %c0_107 = arith.constant 0 : index
    %c256 = arith.constant 256 : index
    %102 = vector.load %arg16[%c0_107, %c256] : memref<1x512xbf16, #tpu.memory_space<vmem>>, vector<1x32xbf16>
    tpu.vector_store %arg16[%c0_107, %c256], %101 {strides = array<i32>} : memref<1x512xbf16, #tpu.memory_space<vmem>>, vector<1x32xbf16>,
    %c9 = arith.constant 9 : index
    %c0_108 = arith.constant 0 : index
    %103 = tpu.strided_load %arg15[%c9, %c0_108] {strides = array<i32: 16, 1>} : memref<16x32xf32, #tpu.memory_space<vmem>>, vector<1x32xf32>
    %104 = arith.truncf %103 : vector<1x32xf32> to vector<1x32xbf16>
    %c0_109 = arith.constant 0 : index
    %c288 = arith.constant 288 : index
    %105 = vector.load %arg16[%c0_109, %c288] : memref<1x512xbf16, #tpu.memory_space<vmem>>, vector<1x32xbf16>
    tpu.vector_store %arg16[%c0_109, %c288], %104 {strides = array<i32>} : memref<1x512xbf16, #tpu.memory_space<vmem>>, vector<1x32xbf16>,
    %c10 = arith.constant 10 : index
    %c0_110 = arith.constant 0 : index
    %106 = tpu.strided_load %arg15[%c10, %c0_110] {strides = array<i32: 16, 1>} : memref<16x32xf32, #tpu.memory_space<vmem>>, vector<1x32xf32>
    %107 = arith.truncf %106 : vector<1x32xf32> to vector<1x32xbf16>
    %c0_111 = arith.constant 0 : index
    %c320 = arith.constant 320 : index
    %108 = vector.load %arg16[%c0_111, %c320] : memref<1x512xbf16, #tpu.memory_space<vmem>>, vector<1x32xbf16>
    tpu.vector_store %arg16[%c0_111, %c320], %107 {strides = array<i32>} : memref<1x512xbf16, #tpu.memory_space<vmem>>, vector<1x32xbf16>,
    %c11 = arith.constant 11 : index
    %c0_112 = arith.constant 0 : index
    %109 = tpu.strided_load %arg15[%c11, %c0_112] {strides = array<i32: 16, 1>} : memref<16x32xf32, #tpu.memory_space<vmem>>, vector<1x32xf32>
    %110 = arith.truncf %109 : vector<1x32xf32> to vector<1x32xbf16>
    %c0_113 = arith.constant 0 : index
    %c352 = arith.constant 352 : index
    %111 = vector.load %arg16[%c0_113, %c352] : memref<1x512xbf16, #tpu.memory_space<vmem>>, vector<1x32xbf16>
    tpu.vector_store %arg16[%c0_113, %c352], %110 {strides = array<i32>} : memref<1x512xbf16, #tpu.memory_space<vmem>>, vector<1x32xbf16>,
    %c12 = arith.constant 12 : index
    %c0_114 = arith.constant 0 : index
    %112 = tpu.strided_load %arg15[%c12, %c0_114] {strides = array<i32: 16, 1>} : memref<16x32xf32, #tpu.memory_space<vmem>>, vector<1x32xf32>
    %113 = arith.truncf %112 : vector<1x32xf32> to vector<1x32xbf16>
    %c0_115 = arith.constant 0 : index
    %c384 = arith.constant 384 : index
    %114 = vector.load %arg16[%c0_115, %c384] : memref<1x512xbf16, #tpu.memory_space<vmem>>, vector<1x32xbf16>
    tpu.vector_store %arg16[%c0_115, %c384], %113 {strides = array<i32>} : memref<1x512xbf16, #tpu.memory_space<vmem>>, vector<1x32xbf16>,
    %c13 = arith.constant 13 : index
    %c0_116 = arith.constant 0 : index
    %115 = tpu.strided_load %arg15[%c13, %c0_116] {strides = array<i32: 16, 1>} : memref<16x32xf32, #tpu.memory_space<vmem>>, vector<1x32xf32>
    %116 = arith.truncf %115 : vector<1x32xf32> to vector<1x32xbf16>
    %c0_117 = arith.constant 0 : index
    %c416 = arith.constant 416 : index
    %117 = vector.load %arg16[%c0_117, %c416] : memref<1x512xbf16, #tpu.memory_space<vmem>>, vector<1x32xbf16>
    tpu.vector_store %arg16[%c0_117, %c416], %116 {strides = array<i32>} : memref<1x512xbf16, #tpu.memory_space<vmem>>, vector<1x32xbf16>,
    %c14 = arith.constant 14 : index
    %c0_118 = arith.constant 0 : index
    %118 = tpu.strided_load %arg15[%c14, %c0_118] {strides = array<i32: 16, 1>} : memref<16x32xf32, #tpu.memory_space<vmem>>, vector<1x32xf32>
    %119 = arith.truncf %118 : vector<1x32xf32> to vector<1x32xbf16>
    %c0_119 = arith.constant 0 : index
    %c448 = arith.constant 448 : index
    %120 = vector.load %arg16[%c0_119, %c448] : memref<1x512xbf16, #tpu.memory_space<vmem>>, vector<1x32xbf16>
    tpu.vector_store %arg16[%c0_119, %c448], %119 {strides = array<i32>} : memref<1x512xbf16, #tpu.memory_space<vmem>>, vector<1x32xbf16>,
    %c15 = arith.constant 15 : index
    %c0_120 = arith.constant 0 : index
    %121 = tpu.strided_load %arg15[%c15, %c0_120] {strides = array<i32: 16, 1>} : memref<16x32xf32, #tpu.memory_space<vmem>>, vector<1x32xf32>
    %122 = arith.truncf %121 : vector<1x32xf32> to vector<1x32xbf16>
    %c0_121 = arith.constant 0 : index
    %c480 = arith.constant 480 : index
    %123 = vector.load %arg16[%c0_121, %c480] : memref<1x512xbf16, #tpu.memory_space<vmem>>, vector<1x32xbf16>
    tpu.vector_store %arg16[%c0_121, %c480], %122 {strides = array<i32>} : memref<1x512xbf16, #tpu.memory_space<vmem>>, vector<1x32xbf16>,
    %c0_122 = arith.constant 0 : index
    %c0_123 = arith.constant 0 : index
    %124 = vector.load %arg16[%c0_122, %c0_123] : memref<1x512xbf16, #tpu.memory_space<vmem>>, vector<1x512xbf16>
    %c0_124 = arith.constant 0 : index
    %c0_125 = arith.constant 0 : index
    %125 = vector.load %arg6[%c0_124, %c0_125] : memref<512x128xbf16, #tpu.memory_space<vmem>>, vector<512x128xbf16>
    %cst_126 = arith.constant dense<0.000000e+00> : vector<1x128xf32>
    %126 = tpu.matmul %124, %125, %cst_126 {dimension_numbers = #tpu.dot_dimension_numbers<[1], [0], [0], [1], [0, 0, 1, 1], [], []>} : vector<1x512xbf16>, vector<512x128xbf16>, vector<1x128xf32> -> vector<1x128xf32>
    %c0_127 = arith.constant 0 : index
    %c0_128 = arith.constant 0 : index
    %127 = vector.load %arg7[%c0_127, %c0_128] : memref<1x128xf32, #tpu.memory_space<vmem>>, vector<1x128xf32>
    %128 = arith.addf %126, %127 : vector<1x128xf32>
    %cst_129 = arith.constant 0.000000e+00 : f32
    %129 = vector.broadcast %cst_129 : f32 to vector<1x128xf32>
    %130 = arith.maximumf %128, %129 : vector<1x128xf32>
    %131 = arith.truncf %130 : vector<1x128xf32> to vector<1x128xbf16>
    %c0_130 = arith.constant 0 : index
    %c0_131 = arith.constant 0 : index
    %132 = vector.load %arg8[%c0_130, %c0_131] : memref<128x128xbf16, #tpu.memory_space<vmem>>, vector<128x128xbf16>
    %cst_132 = arith.constant dense<0.000000e+00> : vector<1x128xf32>
    %133 = tpu.matmul %131, %132, %cst_132 {dimension_numbers = #tpu.dot_dimension_numbers<[1], [0], [0], [1], [0, 0, 1, 1], [], []>} : vector<1x128xbf16>, vector<128x128xbf16>, vector<1x128xf32> -> vector<1x128xf32>
    %c0_133 = arith.constant 0 : index
    %c0_134 = arith.constant 0 : index
    %134 = vector.load %arg9[%c0_133, %c0_134] : memref<1x128xf32, #tpu.memory_space<vmem>>, vector<1x128xf32>
    %135 = arith.addf %133, %134 : vector<1x128xf32>
    %cst_135 = arith.constant dense<0xFF800000> : vector<1xf32>
    %136 = vector.multi_reduction <maximumf>, %135, %cst_135 [1] : vector<1x128xf32> to vector<1xf32>
    %137 = vector.shape_cast %136 : vector<1xf32> to vector<1x1xf32>
    %138 = vector.broadcast %137 : vector<1x1xf32> to vector<1x128xf32>
    %139 = arith.subf %135, %138 : vector<1x128xf32>
    %140 = math.exp %139 : vector<1x128xf32>
    %cst_136 = arith.constant dense<0.000000e+00> : vector<1xf32>
    %141 = vector.multi_reduction <add>, %140, %cst_136 [1] : vector<1x128xf32> to vector<1xf32>
    %142 = vector.shape_cast %141 : vector<1xf32> to vector<1x1xf32>
    %143 = tpu.reciprocal %142 {approx = true} : vector<1x1xf32> -> vector<1x1xf32>
    %144 = vector.broadcast %143 : vector<1x1xf32> to vector<1x128xf32>
    %145 = arith.mulf %140, %144 : vector<1x128xf32>
    %146 = vector.shape_cast %145 : vector<1x128xf32> to vector<1x1x128xf32>
    %c0_137 = arith.constant 0 : index
    %c0_138 = arith.constant 0 : index
    %c0_139 = arith.constant 0 : index
    %147 = vector.load %arg10[%c0_137, %c0_138, %c0_139] : memref<1x1x128xf32, #tpu.memory_space<vmem>>, vector<1x1x128xf32>
    tpu.vector_store %arg10[%c0_137, %c0_138, %c0_139], %146 {strides = array<i32>} : memref<1x1x128xf32, #tpu.memory_space<vmem>>, vector<1x1x128xf32>,
    return
  }
  func.func @transform_0(%arg0: i32) -> (i32, i32, i32) {
    %c0_i32 = arith.constant 0 : i32
    %c0_i32_0 = arith.constant 0 : i32
    %c0_i32_1 = arith.constant 0 : i32
    return %arg0, %c0_i32, %c0_i32_0 : i32, i32, i32
  }
  func.func @transform_1(%arg0: i32) -> (i32, i32) {
    %c0_i32 = arith.constant 0 : i32
    %c0_i32_0 = arith.constant 0 : i32
    %c0_i32_1 = arith.constant 0 : i32
    return %c0_i32, %c0_i32_0 : i32, i32
  }
  func.func @transform_2(%arg0: i32) -> (i32, i32) {
    %c0_i32 = arith.constant 0 : i32
    %c0_i32_0 = arith.constant 0 : i32
    %c0_i32_1 = arith.constant 0 : i32
    return %c0_i32, %c0_i32_0 : i32, i32
  }
  func.func @transform_3(%arg0: i32) -> (i32, i32) {
    %c0_i32 = arith.constant 0 : i32
    %c0_i32_0 = arith.constant 0 : i32
    %c0_i32_1 = arith.constant 0 : i32
    return %c0_i32, %c0_i32_0 : i32, i32
  }
  func.func @transform_4(%arg0: i32) -> (i32, i32) {
    %c0_i32 = arith.constant 0 : i32
    %c0_i32_0 = arith.constant 0 : i32
    %c0_i32_1 = arith.constant 0 : i32
    return %c0_i32, %c0_i32_0 : i32, i32
  }
  func.func @transform_5(%arg0: i32) -> (i32, i32) {
    %c0_i32 = arith.constant 0 : i32
    %c0_i32_0 = arith.constant 0 : i32
    %c0_i32_1 = arith.constant 0 : i32
    return %c0_i32, %c0_i32_0 : i32, i32
  }
  func.func @transform_6(%arg0: i32) -> (i32, i32) {
    %c0_i32 = arith.constant 0 : i32
    %c0_i32_0 = arith.constant 0 : i32
    %c0_i32_1 = arith.constant 0 : i32
    return %c0_i32, %c0_i32_0 : i32, i32
  }
  func.func @transform_7(%arg0: i32) -> (i32, i32) {
    %c0_i32 = arith.constant 0 : i32
    %c0_i32_0 = arith.constant 0 : i32
    %c0_i32_1 = arith.constant 0 : i32
    return %c0_i32, %c0_i32_0 : i32, i32
  }
  func.func @transform_8(%arg0: i32) -> (i32, i32) {
    %c0_i32 = arith.constant 0 : i32
    %c0_i32_0 = arith.constant 0 : i32
    %c0_i32_1 = arith.constant 0 : i32
    return %c0_i32, %c0_i32_0 : i32, i32
  }
  func.func @transform_9(%arg0: i32) -> (i32, i32, i32) {
    %c0_i32 = arith.constant 0 : i32
    %c0_i32_0 = arith.constant 0 : i32
    %c0_i32_1 = arith.constant 0 : i32
    return %arg0, %c0_i32, %c0_i32_0 : i32, i32, i32
  }
}

</mosaic_0001>

<bundles_post_ra>
// kernel: simple_cnn_forward.1
= control target key start
LH: loop header
LB: loop body
LE: loop exit
PB: predicated region body
PF: predicated region fallthrough
CT: control target
= control target key end

     0   :  { %14 = vsyncpa [#allocation9], 0  ;;  %s3783_s0 = inlined_call_operand.vmem [shape: bf16[2,256,27], index: 0, kind: input, shape index: {}]   ;;  %s3784_s1 = inlined_call_operand.vmem [shape: bf16[27,16], index: 1, kind: input, shape index: {}]   ;;  %s3785_s2 = inlined_call_operand.vmem [shape: f32[1,16], index: 2, kind: input, shape index: {}]   ;;  %s3786_s3 = inlined_call_operand.vmem [shape: bf16[144,32], index: 3, kind: input, shape index: {}]   ;;  %s3787_s4 = inlined_call_operand.vmem [shape: f32[1,32], index: 4, kind: input, shape index: {}]   ;;  %s3788_s5 = inlined_call_operand.vmem [shape: bf16[512,128], index: 5, kind: input, shape index: {}]   ;;  %s3789_s6 = inlined_call_operand.vmem [shape: f32[1,128], index: 6, kind: input, shape index: {}]   ;;  %s3790_s7 = inlined_call_operand.vmem [shape: bf16[128,128], index: 7, kind: input, shape index: {}]   ;;  %s3791_s8 = inlined_call_operand.vmem [shape: f32[1,128], index: 8, kind: input, shape index: {}]   ;;  %s3792_s9 = inlined_call_operand.hbm [shape: f32[2,1,128], index: 9, kind: output, shape index: {}]  }
   0x1   :  { %16 = vsyncpa [#allocation9 + $0x1], 0  ;;  %s3108_s30 = smov 0   ;;  %s3110_s10 = smov 0  }
   0x2   :  { %s3112_s11 = smov 0   ;;  %s3114_s12 = smov 0  }
   0x3 LB: > { %s3129_s13 = sadd.s32 4294967295, %s3043_s12   ;;  %s2472_s14 = sadd.s32 4294967294, %s3043_s12   ;;  %s3043_s12 = sphi %s3114_s12, %s3809_s12   ;;  %s3039_s11 = sphi %s3112_s11, %s3808_s11   ;;  %s3035_s10 = sphi %s3110_s10, %s3807_s10   ;;  %s3031_s30 = sphi %s3108_s30, %s3806_s30  }
   0x4   : > { %s3133_s15 = sadd.s32 1, %s3043_s12   ;;  %s223_s16 = sadd.s32 1, %s3039_s11 }
   0x5   : > { %s220_s17 = ssub.s32 %s3043_s12, %s3133_s15  ;;  %p233_p0 = scmp.ne.s32.totalorder %s3039_s11, %s3035_s10 }
   0x6   : > { %p221_p1 = scmp.eq.s32.totalorder %s220_s17, 0  ;;  %p234_p2 = scmp.eq.s32.totalorder %s3129_s13, 1 }
   0x7   : > { %p239_p3 = scmp.ne.s32.totalorder %s3035_s10, %s3031_s30  ;;  %p240_p4 = scmp.eq.s32.totalorder %s2472_s14, 1 }
   0x8   : > { %s3144_s18 = scalar_select %p221_p1, %s3039_s11, %s223_s16  }
   0x9   : > { %p3146_p5 = por %p234_p2, %p233_p0  ;;  %p3150_p6 = por %p240_p4, %p239_p3 }
   0xa   : > { %p2475_p7 = scmp.ge.s32.totalorder %s3043_s12, 1  ;;  %p290_p8 = scmp.lt.s32.totalorder %s3043_s12, 3 }
   0xc   : > { %p291_p9 = pnand %p2475_p7, %p290_p8 }
   0xd   : > { %p325_p10 = scmp.lt.s32.totalorder (!%p291_p9), %s3129_s13, 1  ;;  %s3047_s14 = smov (!%p291_p9), 32  }
   0xe   : > { %294 = sbr.rel (%p291_p9) target bundleno = 1584 (0x630), region = 56  ;;  %s3048_s16 = smov (!%p291_p9), 16  }
   0xf   : > { %s3793_s17 = smov (!%p291_p9), 96   ;;  %s3051_s24 = smov (!%p291_p9), 48  }
  0x10   : > { %s3052_s27 = smov (!%p291_p9), 64   ;;  %s3053_s21 = smov (!%p291_p9), 80  }
  0x11   : > { %s3054_s28 = smov (!%p291_p9), 112  }
  0x13   : > { %v2902_v0 = vld [vmem:[%s3784_s1 + $0x8] sm:$0x3f]   ;;  %vm514_vm0 = vcmask 1044480   ;;  %vm515_vm1 = vcmask 1045504   ;;  %v3045_v1 = vmov 65535   ;;  %v2903_v5 = vld [vmem:[%s3784_s1] sm:$0xff]  }
  0x14   : > { %v516_v2 = vsel %vm514_vm0, 4294967295, %v3045_v1  ;;  %s326_s25 = scalar_select %p325_p10, %s3129_s13, 1  ;;  %vm465_vm2 = vcmask 220160   ;;  %vm730_vm3 = vcmask 130048   ;;  %vm787_vm4 = vcmask 123904   ;;  %v2920_v1 = vld [vmem:[%s3786_s3 + $0x38] sm:$0xff]  }
  0x15   : > { %v517_v3 = vsel %vm515_vm1, %v516_v2, 0  ;;  %v3046_v22 = vmov 0.0   ;;  %v3247_v29 = vld [vmem:[%s3785_s2] ss:$0 sm:$0xff]  ;;  %v3050_v48 = vmov 0   ;;  %vm856_vm5 = vcmask 125952  }
  0x16   : > { %v519_v4 = vand.u32 %v2902_v0, %v517_v3  ;;  %s2651_s26 = sshll.u32 %s326_s25, 7  ;;  %786 = vst.msk [vmem:[#allocation3] sm:$0xff] %vm730_vm3, %v3046_v22  ;;  %789 = vst.msk [vmem:[#allocation3 + $0x10] sm:$0xff] %vm730_vm3, %v3046_v22  ;;  %1504 = vmatprep.subr.bf16.mxu1 %v3050_v48  ;;  %vm921_vm6 = vcmask 257152   ;;  %vm986_vm7 = vcmask 388352   ;;  %vm1051_vm8 = vcmask 519552  }
  0x17   : > { %s3167_s29 = scalar_lea.vmem %s3783_s0, %s2651_s26  ;;  %788 = vst.msk [vmem:[#allocation3 + $0x8] sm:$0x3] %vm787_vm4, %v3046_v22  ;;  %790 = vst.msk [vmem:[#allocation3 + $0x18] sm:$0x3] %vm787_vm4, %v3046_v22  ;;  %1505 = vmatpush1.bf16.msra.mxu1 %v2920_v1  ;;  %vm1116_vm9 = vcmask 650752   ;;  %vm1181_vm10 = vcmask 781952  }
  0x18   : > { %2795 = vmatprep.subr.bf16.mxu0 %v519_v4  ;;  %v2904_v6 = vld [vmem:[%s3167_s29] sm:$0xff]   ;;  %v2905_v7 = vld [vmem:[%s3167_s29 + $0x8] sm:$0xff]   ;;  %v2906_v8 = vld [vmem:[%s3167_s29 + $0x10] sm:$0xff]   ;;  %791 = vst.msk [vmem:[#allocation3 + $0x20] sm:$0xff] %vm730_vm3, %v3046_v22  ;;  %1506 = vmatprep.subr.bf16.mxu1 %v3050_v48  ;;  %vm1247_vm11 = vcmask 913152   ;;  %vm1312_vm12 = vcmask 1044352  }
  0x19   : > { %2796 = vmatpush3.bf16.msra.mxu0 %v519_v4  ;;  %2799 = vmatprep.mubr.msk.bf16.mxu0 %vm465_vm2, %v2904_v6  ;;  %v2907_v9 = vld [vmem:[%s3167_s29 + $0x18] sm:$0xff]   ;;  %v2908_v10 = vld [vmem:[%s3167_s29 + $0x20] sm:$0xff]   ;;  %v2909_v11 = vld [vmem:[%s3167_s29 + $0x28] sm:$0xff]   ;;  %792 = vst.msk [vmem:[#allocation3 + $0x28] sm:$0x3] %vm787_vm4, %v3046_v22  ;;  %vm1581_vm13 = vcmask 261120  }
  0x1a   : > { %2797 = vmatprep.subr.bf16.mxu0 %v2903_v5  ;;  %v2910_v12 = vld [vmem:[%s3167_s29 + $0x30] sm:$0xff]   ;;  %v2911_v13 = vld [vmem:[%s3167_s29 + $0x38] sm:$0xff]   ;;  %v2912_v14 = vld [vmem:[%s3167_s29 + $0x40] sm:$0xff]   ;;  %793 = vst.msk [vmem:[#allocation3 + $0x30] sm:$0xff] %vm730_vm3, %v3046_v22  ;;  %vm1599_vm14 = vcmask 253952   ;;  %s3799_s25 = smov 96  }
  0x1b   : > { %v2913_v15 = vld [vmem:[%s3167_s29 + $0x48] sm:$0xff]   ;;  %v2914_v16 = vld [vmem:[%s3167_s29 + $0x50] sm:$0xff]   ;;  %v2915_v17 = vld [vmem:[%s3167_s29 + $0x58] sm:$0xff]   ;;  %794 = vst.msk [vmem:[#allocation3 + $0x38] sm:$0x3] %vm787_vm4, %v3046_v22  ;;  %vm1626_vm1 = vcmask 516352  }
  0x1c   : > { %v2916_v18 = vld [vmem:[%s3167_s29 + $0x60] sm:$0xff]   ;;  %v2917_v19 = vld [vmem:[%s3167_s29 + $0x68] sm:$0xff]   ;;  %v2918_v20 = vld [vmem:[%s3167_s29 + $0x70] sm:$0xff]   ;;  %795 = vst.msk [vmem:[#allocation3 + $0x40] sm:$0xff] %vm730_vm3, %v3046_v22  ;;  %vm1600_vm15 = vsmask.f32 256 }
  0x1d   : > { %2798 = vmatpush3.bf16.msra.mxu0 %v2903_v5  ;;  %v2919_v21 = vld [vmem:[%s3167_s29 + $0x78] sm:$0xff]   ;;  %796 = vst.msk [vmem:[#allocation3 + $0x48] sm:$0x3] %vm787_vm4, %v3046_v22  ;;  %798 = vst.msk [vmem:[#allocation3 + $0x58] sm:$0x3] %vm787_vm4, %v3046_v22  ;;  %v816_v45 = vld [vmem:[#allocation3] sm:$0xff] }
  0x1e   : > { %797 = vst.msk [vmem:[#allocation3 + $0x50] sm:$0xff] %vm730_vm3, %v3046_v22  ;;  %799 = vst.msk [vmem:[#allocation3 + $0x60] sm:$0xff] %vm730_vm3, %v3046_v22  ;;  %v930_v23 = vld [vmem:[#allocation3 + $0x2] sm:$0xff]  ;;  %v2652_v47 = vpack.c.bf16 %v816_v45, %v816_v45 }
  0x1f   : > { %800 = vst.msk [vmem:[#allocation3 + $0x68] sm:$0x3] %vm787_vm4, %v3046_v22  ;;  %802 = vst.msk [vmem:[#allocation3 + $0x78] sm:$0x3] %vm787_vm4, %v3046_v22  ;;  %v2668_v24 = vpack.c.bf16 %v930_v23, %v930_v23  ;;  %v865_v25 = vld [vmem:[#allocation3 + $0x1] sm:$0xff] }
  0x20   : > { %2800 = vmatmul.mubr.msk.bf16.vlgmr.msra.gmra.mxu0 %vm465_vm2, %v2905_v7  ;;  %801 = vst.msk [vmem:[#allocation3 + $0x70] sm:$0xff] %vm730_vm3, %v3046_v22  ;;  %803 = vst.msk [vmem:[#allocation3 + $0x80] sm:$0xff] %vm730_vm3, %v3046_v22  ;;  %v2660_v26 = vpack.c.bf16 %v865_v25, %v865_v25 }
  0x21   : > { %2803 = vmatprep.mubr.msk.bf16.mxu0 %vm465_vm2, %v2906_v8  ;;  %804 = vst.msk [vmem:[#allocation3 + $0x88] sm:$0x3] %vm787_vm4, %v3046_v22  ;;  %806 = vst.msk [vmem:[#allocation3 + $0x98] sm:$0x3] %vm787_vm4, %v3046_v22  ;;  %962 = vrot.lane.b32.xlu1 %v2668_v24, %s3047_s14 }
  0x22   : > { %805 = vst.msk [vmem:[#allocation3 + $0x90] sm:$0xff] %vm730_vm3, %v3046_v22  ;;  %897 = vrot.lane.b32.xlu0 %v2660_v26, %s3048_s16  ;;  %vm3542_vm0 = vmand %vm1599_vm14, %vm1600_vm15 }
  0x23   : > { %857 = vst.msk [vmem:[#allocation4] sm:$0xf] %vm856_vm5, %v2652_v47  ;;  %v2924_v47 = vld [vmem:[%s3786_s3 + $0x18] sm:$0xff]  }
  0x28   : > { %2804 = vmatmul.mubr.msk.bf16.gmra.mxu0 %vm465_vm2, %v2907_v9 }
  0x29   : > { %2807 = vmatprep.mubr.msk.bf16.mxu0 %vm465_vm2, %v2908_v10  ;;  %v1198_v27 = vld [vmem:[#allocation3 + $0x90] sm:$0xff] }
  0x2a   : > { %v2707_v28 = vpack.c.bf16 %v1198_v27, %v1198_v27 }
  0x2c   : > { %1237 = vrot.lane.b32.xlu1 %v2707_v28, %s3793_s17 }
  0x30   : > { %2808 = vmatmul.mubr.msk.bf16.gmra.mxu0 %vm465_vm2, %v2909_v11 }
  0x31   : > { %2811 = vmatprep.mubr.msk.bf16.mxu0 %vm465_vm2, %v2910_v12  ;;  %v2921_v12 = vld [vmem:[%s3786_s3 + $0x30] sm:$0xff]  }
  0x32   : > { %1507 = vmatpush1.bf16.msra.mxu1 %v2921_v12 }
  0x33   : > { %1508 = vmatprep.subr.bf16.mxu1 %v3050_v48 }
  0x38   : > { %2812 = vmatmul.mubr.msk.bf16.gmra.mxu0 %vm465_vm2, %v2911_v13 }
  0x39   : > { %2815 = vmatprep.mubr.msk.bf16.mxu0 %vm465_vm2, %v2912_v14 }
  0x40   : > { %2816 = vmatmul.mubr.msk.bf16.gmra.mxu0 %vm465_vm2, %v2913_v15 }
  0x41   : > { %2819 = vmatprep.mubr.msk.bf16.mxu0 %vm465_vm2, %v2914_v16 }
  0x48   : > { %2820 = vmatmul.mubr.msk.bf16.gmra.mxu0 %vm465_vm2, %v2915_v17 }
  0x49   : > { %2823 = vmatprep.mubr.msk.bf16.mxu0 %vm465_vm2, %v2916_v18 }
  0x50   : > { %2824 = vmatmul.mubr.msk.bf16.gmra.mxu0 %vm465_vm2, %v2917_v19 }
  0x51   : > { %2827 = vmatprep.mubr.msk.bf16.mxu0 %vm465_vm2, %v2918_v20  ;;  %v2922_v20 = vld [vmem:[%s3786_s3 + $0x28] sm:$0xff]  }
  0x52   : > { %1509 = vmatpush1.bf16.msra.mxu1 %v2922_v20 }
  0x53   : > { %1510 = vmatprep.subr.bf16.mxu1 %v3050_v48 }
  0x58   : > { %2828 = vmatmul.mubr.msk.bf16.gmra.mxu0 %vm465_vm2, %v2919_v21  ;;  %vm3671_vm2 = vmand %vm1626_vm1, %vm1600_vm15 }
  0x93   : > { %v963_v60 = vpop.permute.xlu1 %962 }
  0x94   : > { %v898_v56 = vpop.permute.xlu0 %897 }
  0x95   : > { %922 = vst.msk [vmem:[#allocation4] sm:$0xf] %vm921_vm6, %v898_v56 }
  0x96   : > { %987 = vst.msk [vmem:[#allocation4] sm:$0xf] %vm986_vm7, %v963_v60 }
  0xe0   : > { %v2801_v30 = vpop.f32.mrf.mxu0 }
  0xe1   : > { %v564_v31 = vadd.f32 %v2801_v30, %v3247_v29 }
  0xe2   : > { %v555_v32 = vpop.f32.mrf.mxu0 }
  0xe3   : > { %v556_v33 = vadd.f32 %v3247_v29, %v555_v32  ;;  %v684_v35 = vmax.f32 %v564_v31, 0.0 }
  0xe4   : > { %v2802_v34 = vpop.f32.mrf.mxu0 }
  0xe5   : > { %v682_v36 = vmax.f32 %v556_v33, 0.0  ;;  %v567_v37 = vadd.f32 %v2802_v34, %v3247_v29 }
  0xe6   : > { %v558_v38 = vpop.f32.mrf.mxu0 }
  0xe7   : > { %v714_v39 = vmax.f32 %v682_v36, %v684_v35  ;;  %v559_v40 = vadd.f32 %v3247_v29, %v558_v38  ;;  %v685_v42 = vmax.f32 %v567_v37, 0.0 }
  0xe8   : > { %v2805_v41 = vpop.f32.mrf.mxu0 }
  0xe9   : > { %731 = vst.msk [vmem:[#allocation2] sm:$0xff] %vm730_vm3, %v714_v39  ;;  %v683_v43 = vmax.f32 %v559_v40, 0.0  ;;  %v580_v44 = vadd.f32 %v2805_v41, %v3247_v29  ;;  %v2923_v39 = vld [vmem:[%s3786_s3 + $0x20] sm:$0xff]  }
  0xea   : > { %v571_v46 = vpop.f32.mrf.mxu0  ;;  %1511 = vmatpush1.bf16.msra.mxu1 %v2923_v39 }
  0xeb   : > { %v715_v49 = vmax.f32 %v683_v43, %v685_v42  ;;  %v572_v50 = vadd.f32 %v3247_v29, %v571_v46  ;;  %v688_v52 = vmax.f32 %v580_v44, 0.0  ;;  %1512 = vmatprep.subr.bf16.mxu1 %v3050_v48 }
  0xec   : > { %v2806_v51 = vpop.f32.mrf.mxu0 }
  0xed   : > { %732 = vst.msk [vmem:[#allocation2 + $0x8] sm:$0xff] %vm730_vm3, %v715_v49  ;;  %v686_v53 = vmax.f32 %v572_v50, 0.0  ;;  %v583_v54 = vadd.f32 %v2806_v51, %v3247_v29 }
  0xee   : > { %v574_v55 = vpop.f32.mrf.mxu0  ;;  %1513 = vmatpush1.bf16.msra.mxu1 %v2924_v47 }
  0xef   : > { %v716_v57 = vmax.f32 %v686_v53, %v688_v52  ;;  %v575_v58 = vadd.f32 %v3247_v29, %v574_v55  ;;  %v689_v61 = vmax.f32 %v583_v54, 0.0  ;;  %1514 = vmatprep.subr.bf16.mxu1 %v3050_v48 }
  0xf0   : > { %v2809_v59 = vpop.f32.mrf.mxu0 }
  0xf1   : > { %733 = vst.msk [vmem:[#allocation2 + $0x10] sm:$0xff] %vm730_vm3, %v716_v57  ;;  %v687_v62 = vmax.f32 %v575_v58, 0.0  ;;  %v596_v63 = vadd.f32 %v2809_v59, %v3247_v29 }
  0xf2   : > { %v587_v0 = vpop.f32.mrf.mxu0 }
  0xf3   : > { %v717_v2 = vmax.f32 %v687_v62, %v689_v61  ;;  %v692_v3 = vmax.f32 %v596_v63, 0.0  ;;  %v588_v4 = vadd.f32 %v3247_v29, %v587_v0  ;;  %v2925_v63 = vld [vmem:[%s3786_s3 + $0x10] sm:$0xff]  }
  0xf4   : > { %v747_v5 = vld [vmem:[#allocation2] ss:$2 sm:$0xff]  ;;  %v763_v6 = vld [vmem:[#allocation2 + $0x1] ss:$2 sm:$0xff]  ;;  %v2810_v7 = vpop.f32.mrf.mxu0  ;;  %1515 = vmatpush1.bf16.msra.mxu1 %v2925_v63 }
  0xf5   : > { %v778_v8 = vmax.f32 %v747_v5, %v763_v6  ;;  %734 = vst.msk [vmem:[#allocation2 + $0x18] sm:$0xff] %vm730_vm3, %v717_v2  ;;  %v690_v9 = vmax.f32 %v588_v4, 0.0  ;;  %v599_v10 = vadd.f32 %v2810_v7, %v3247_v29  ;;  %1516 = vmatprep.subr.bf16.mxu1 %v3050_v48 }
  0xf6   : > { %v590_v11 = vpop.f32.mrf.mxu0 }
  0xf7   : > { %v718_v13 = vmax.f32 %v690_v9, %v692_v3  ;;  %v591_v14 = vadd.f32 %v3247_v29, %v590_v11  ;;  %808 = vst.msk [vmem:[#allocation3 + $0x11] sm:$0xff] %vm730_vm3, %v778_v8  ;;  %v693_v16 = vmax.f32 %v599_v10, 0.0  ;;  %v2926_v8 = vld [vmem:[%s3786_s3 + $0x8] sm:$0xff]  }
  0xf8   : > { %v2813_v15 = vpop.f32.mrf.mxu0  ;;  %1517 = vmatpush1.bf16.msra.mxu1 %v2926_v8 }
  0xf9   : > { %735 = vst.msk [vmem:[#allocation2 + $0x20] sm:$0xff] %vm730_vm3, %v718_v13  ;;  %v691_v17 = vmax.f32 %v591_v14, 0.0  ;;  %v612_v18 = vadd.f32 %v2813_v15, %v3247_v29  ;;  %1518 = vmatprep.subr.bf16.mxu1 %v3050_v48 }
  0xfa   : > { %v603_v19 = vpop.f32.mrf.mxu0 }
  0xfb   : > { %v719_v21 = vmax.f32 %v691_v17, %v693_v16  ;;  %v696_v23 = vmax.f32 %v612_v18, 0.0  ;;  %v604_v24 = vadd.f32 %v3247_v29, %v603_v19 }
  0xfc   : > { %v749_v25 = vld [vmem:[#allocation2 + $0x10] ss:$2 sm:$0xff]  ;;  %v765_v26 = vld [vmem:[#allocation2 + $0x11] ss:$2 sm:$0xff]  ;;  %v2814_v27 = vpop.f32.mrf.mxu0 }
  0xfd   : > { %v779_v28 = vmax.f32 %v749_v25, %v765_v26  ;;  %736 = vst.msk [vmem:[#allocation2 + $0x28] sm:$0xff] %vm730_vm3, %v719_v21  ;;  %v694_v30 = vmax.f32 %v604_v24, 0.0  ;;  %v615_v31 = vadd.f32 %v2814_v27, %v3247_v29  ;;  %v2927_v25 = vld [vmem:[%s3786_s3] sm:$0xff]  }
  0xfe   : > { %v931_v32 = vld [vmem:[#allocation3 + $0x12] sm:$0xff]  ;;  %v606_v34 = vpop.f32.mrf.mxu0  ;;  %1519 = vmatpush1.bf16.msra.mxu1 %v2927_v25 }
  0xff   : > { %v866_v33 = vld [vmem:[#allocation3 + $0x11] sm:$0xff]  ;;  %809 = vst.msk [vmem:[#allocation3 + $0x21] sm:$0xff] %vm730_vm3, %v779_v28  ;;  %v720_v36 = vmax.f32 %v694_v30, %v696_v23  ;;  %v3288_v37 = vpack.c.bf16 %v931_v32, %v931_v32  ;;  %v697_v40 = vmax.f32 %v615_v31, 0.0  ;;  %v607_v41 = vadd.f32 %v3247_v29, %v606_v34  ;;  %v2928_v34 = vld [vmem:[%s3786_s3 + $0x40] sm:$0xff]   ;;  %1534 = vmatprep.subr.bf16.mxu1 %v3050_v48 }
 0x100   : > { %v995_v35 = vld [vmem:[#allocation3 + $0x10] sm:$0xff]  ;;  %v2661_v38 = vpack.c.bf16 %v866_v33, %v866_v33  ;;  %v2817_v43 = vpop.f32.mrf.mxu0 }
 0x101   : > { %v2676_v42 = vpack.c.bf16 %v995_v35, %v995_v35  ;;  %737 = vst.msk [vmem:[#allocation2 + $0x30] sm:$0xff] %vm730_vm3, %v720_v36  ;;  %964 = vrot.lane.b32.xlu1 %v3288_v37, %s3047_s14  ;;  %v628_v44 = vadd.f32 %v2817_v43, %v3247_v29  ;;  %v695_v45 = vmax.f32 %v607_v41, 0.0 }
 0x102   : > { %899 = vrot.lane.b32.xlu0 %v2661_v38, %s3048_s16  ;;  %v619_v46 = vpop.f32.mrf.mxu0  ;;  %1535 = vmatpush2.bf16.msra.mxu1 %v2928_v34 }
 0x103   : > { %858 = vst.msk [vmem:[#allocation4 + $0x8] sm:$0xf] %vm856_vm5, %v2676_v42  ;;  %v700_v49 = vmax.f32 %v628_v44, 0.0  ;;  %v620_v50 = vadd.f32 %v3247_v29, %v619_v46  ;;  %v721_v53 = vmax.f32 %v695_v45, %v697_v40 }
 0x104   : > { %v751_v51 = vld [vmem:[#allocation2 + $0x20] ss:$2 sm:$0xff]  ;;  %v767_v52 = vld [vmem:[#allocation2 + $0x21] ss:$2 sm:$0xff]  ;;  %v2818_v54 = vpop.f32.mrf.mxu0 }
 0x105   : > { %v780_v55 = vmax.f32 %v751_v51, %v767_v52  ;;  %v698_v56 = vmax.f32 %v620_v50, 0.0  ;;  %v631_v57 = vadd.f32 %v2818_v54, %v3247_v29  ;;  %738 = vst.msk [vmem:[#allocation2 + $0x38] sm:$0xff] %vm730_vm3, %v721_v53 }
 0x106   : > { %1027 = vrot.lane.b32.xlu0 %v2676_v42, %s3051_s24  ;;  %v996_v58 = vld [vmem:[#allocation3 + $0x20] sm:$0xff]  ;;  %v622_v59 = vpop.f32.mrf.mxu0 }
 0x107   : > { %v1126_v60 = vld [vmem:[#allocation3 + $0x22] sm:$0xff]  ;;  %810 = vst.msk [vmem:[#allocation3 + $0x31] sm:$0xff] %vm730_vm3, %v780_v55  ;;  %v2677_v61 = vpack.c.bf16 %v996_v58, %v996_v58  ;;  %v722_v62 = vmax.f32 %v698_v56, %v700_v49  ;;  %v701_v1 = vmax.f32 %v631_v57, 0.0  ;;  %v623_v2 = vadd.f32 %v3247_v29, %v622_v59 }
 0x108   : > { %v1061_v0 = vld [vmem:[#allocation3 + $0x21] sm:$0xff]  ;;  %v3314_v3 = vpack.c.bf16 %v1126_v60, %v1126_v60  ;;  %v2821_v4 = vpop.f32.mrf.mxu0 }
 0x109   : > { %1029 = vrot.lane.b32.xlu1 %v2677_v61, %s3051_s24  ;;  %739 = vst.msk [vmem:[#allocation2 + $0x40] sm:$0xff] %vm730_vm3, %v722_v62  ;;  %v644_v5 = vadd.f32 %v2821_v4, %v3247_v29  ;;  %v699_v6 = vmax.f32 %v623_v2, 0.0  ;;  %v3326_v9 = vpack.c.bf16 %v1061_v0, %v1061_v0 }
 0x10a   : > { %1092 = vrot.lane.b32.xlu0 %v2661_v38, %s3052_s27  ;;  %859 = vst.msk [vmem:[#allocation4 + $0x10] sm:$0xf] %vm856_vm5, %v2677_v61  ;;  %v635_v7 = vpop.f32.mrf.mxu0  ;;  %1361 = vst.msk [vmem:[#allocation4 + $0x4] sm:$0xf] %vm856_vm5, %v3314_v3 }
 0x10b   : > { %v704_v10 = vmax.f32 %v644_v5, 0.0  ;;  %v636_v11 = vadd.f32 %v3247_v29, %v635_v7  ;;  %v723_v12 = vmax.f32 %v699_v6, %v701_v1 }
 0x10c   : > { %v2822_v13 = vpop.f32.mrf.mxu0  ;;  %v753_v14 = vld [vmem:[#allocation2 + $0x30] ss:$2 sm:$0xff]  ;;  %v769_v15 = vld [vmem:[#allocation2 + $0x31] ss:$2 sm:$0xff] }
 0x10d   : > { %1094 = vrot.lane.b32.xlu1 %v3326_v9, %s3052_s27  ;;  %v702_v16 = vmax.f32 %v636_v11, 0.0  ;;  %v647_v17 = vadd.f32 %v2822_v13, %v3247_v29  ;;  %v781_v18 = vmax.f32 %v753_v14, %v769_v15  ;;  %740 = vst.msk [vmem:[#allocation2 + $0x48] sm:$0xff] %vm730_vm3, %v723_v12 }
 0x10e   : > { %1157 = vrot.lane.b32.xlu0 %v3288_v37, %s3053_s21  ;;  %v1192_v19 = vld [vmem:[#allocation3 + $0x30] sm:$0xff]  ;;  %v638_v20 = vpop.f32.mrf.mxu0 }
 0x10f   : > { %v933_v21 = vld [vmem:[#allocation3 + $0x32] sm:$0xff]  ;;  %v3336_v23 = vpack.c.bf16 %v1192_v19, %v1192_v19  ;;  %v724_v24 = vmax.f32 %v702_v16, %v704_v10  ;;  %811 = vst.msk [vmem:[#allocation3 + $0x41] sm:$0xff] %vm730_vm3, %v781_v18  ;;  %v705_v26 = vmax.f32 %v647_v17, 0.0  ;;  %v639_v27 = vadd.f32 %v3247_v29, %v638_v20 }
 0x110   : > { %v3344_v28 = vpack.c.bf16 %v933_v21, %v933_v21  ;;  %v2825_v30 = vpop.f32.mrf.mxu0  ;;  %v1257_v37 = vld [vmem:[#allocation3 + $0x31] sm:$0xff] }
 0x111   : > { %1159 = vrot.lane.b32.xlu1 %v3314_v3, %s3053_s21  ;;  %741 = vst.msk [vmem:[#allocation2 + $0x50] sm:$0xff] %vm730_vm3, %v724_v24  ;;  %v660_v31 = vadd.f32 %v2825_v30, %v3247_v29  ;;  %v703_v32 = vmax.f32 %v639_v27, 0.0  ;;  %v2709_v48 = vpack.c.bf16 %v1257_v37, %v1257_v37 }
 0x112   : > { %1223 = vrot.lane.b32.xlu0 %v2677_v61, %s3793_s17  ;;  %860 = vst.msk [vmem:[#allocation4 + $0x18] sm:$0xf] %vm856_vm5, %v3336_v23  ;;  %v651_v33 = vpop.f32.mrf.mxu0  ;;  %1362 = vst.msk [vmem:[#allocation4 + $0xc] sm:$0xf] %vm856_vm5, %v3344_v28 }
 0x113   : > { %v708_v35 = vmax.f32 %v660_v31, 0.0  ;;  %v652_v36 = vadd.f32 %v3247_v29, %v651_v33  ;;  %v725_v38 = vmax.f32 %v703_v32, %v705_v26 }
 0x114   : > { %v2826_v39 = vpop.f32.mrf.mxu0  ;;  %v755_v40 = vld [vmem:[#allocation2 + $0x40] ss:$2 sm:$0xff]  ;;  %v771_v41 = vld [vmem:[#allocation2 + $0x41] ss:$2 sm:$0xff] }
 0x115   : > { %1225 = vrot.lane.b32.xlu1 %v3336_v23, %s3793_s17  ;;  %v706_v42 = vmax.f32 %v652_v36, 0.0  ;;  %v663_v43 = vadd.f32 %v2826_v39, %v3247_v29  ;;  %v782_v44 = vmax.f32 %v755_v40, %v771_v41  ;;  %742 = vst.msk [vmem:[#allocation2 + $0x58] sm:$0xff] %vm730_vm3, %v725_v38  ;;  %v1328_v39 = vld [vmem:[#allocation3 + $0x92] sm:$0xff] }
 0x116   : > { %1288 = vrot.lane.b32.xlu0 %v3326_v9, %s3054_s28  ;;  %v654_v45 = vpop.f32.mrf.mxu0  ;;  %v998_v46 = vld [vmem:[#allocation3 + $0x40] sm:$0xff]  ;;  %v2723_v41 = vpack.c.bf16 %v1328_v39, %v1328_v39 }
 0x117   : > { %v726_v47 = vmax.f32 %v706_v42, %v708_v35  ;;  %v709_v49 = vmax.f32 %v663_v43, 0.0  ;;  %v655_v50 = vadd.f32 %v3247_v29, %v654_v45  ;;  %v1128_v51 = vld [vmem:[#allocation3 + $0x42] sm:$0xff]  ;;  %812 = vst.msk [vmem:[#allocation3 + $0x51] sm:$0xff] %vm730_vm3, %v782_v44  ;;  %v2679_v52 = vpack.c.bf16 %v998_v46, %v998_v46  ;;  %v1263_v44 = vld [vmem:[#allocation3 + $0x91] sm:$0xff] }
 0x118   : > { %v3368_v53 = vpack.c.bf16 %v1128_v51, %v1128_v51  ;;  %v2829_v54 = vpop.f32.mrf.mxu0  ;;  %1368 = vst.msk [vmem:[#allocation4 + $0x3c] sm:$0xf] %vm856_vm5, %v2723_v41  ;;  %v2715_v45 = vpack.c.bf16 %v1263_v44, %v1263_v44 }
 0x119   : > { %1290 = vrot.lane.b32.xlu1 %v2709_v48, %s3054_s28  ;;  %743 = vst.msk [vmem:[#allocation2 + $0x60] sm:$0xff] %vm730_vm3, %v726_v47  ;;  %v707_v55 = vmax.f32 %v655_v50, 0.0  ;;  %v676_v56 = vadd.f32 %v2829_v54, %v3247_v29 }
 0x11a   : > { %901 = vrot.lane.b32.xlu0 %v3326_v9, %s3048_s16  ;;  %v667_v57 = vpop.f32.mrf.mxu0  ;;  %861 = vst.msk [vmem:[#allocation4 + $0x20] sm:$0xf] %vm856_vm5, %v2679_v52  ;;  %1363 = vst.msk [vmem:[#allocation4 + $0x14] sm:$0xf] %vm856_vm5, %v3368_v53 }
 0x11b   : > { %v727_v58 = vmax.f32 %v707_v55, %v709_v49  ;;  %v712_v59 = vmax.f32 %v676_v56, 0.0  ;;  %v668_v60 = vadd.f32 %v3247_v29, %v667_v57 }
 0x11c   : > { %v2830_v61 = vpop.f32.mrf.mxu0  ;;  %v757_v62 = vld [vmem:[#allocation2 + $0x50] ss:$2 sm:$0xff]  ;;  %v773_v63 = vld [vmem:[#allocation2 + $0x51] ss:$2 sm:$0xff] }
 0x11d   : > { %903 = vrot.lane.b32.xlu1 %v2709_v48, %s3048_s16  ;;  %744 = vst.msk [vmem:[#allocation2 + $0x68] sm:$0xff] %vm730_vm3, %v727_v58  ;;  %v710_v0 = vmax.f32 %v668_v60, 0.0  ;;  %v679_v1 = vadd.f32 %v2830_v61, %v3247_v29  ;;  %v783_v2 = vmax.f32 %v757_v62, %v773_v63 }
 0x11e   : > { %966 = vrot.lane.b32.xlu0 %v3314_v3, %s3047_s14  ;;  %v670_v4 = vpop.f32.mrf.mxu0  ;;  %v1194_v5 = vld [vmem:[#allocation3 + $0x50] sm:$0xff] }
 0x11f   : > { %v728_v6 = vmax.f32 %v710_v0, %v712_v59  ;;  %v713_v7 = vmax.f32 %v679_v1, 0.0  ;;  %v671_v8 = vadd.f32 %v3247_v29, %v670_v4  ;;  %v935_v9 = vld [vmem:[#allocation3 + $0x52] sm:$0xff]  ;;  %813 = vst.msk [vmem:[#allocation3 + $0x61] sm:$0xff] %vm730_vm3, %v783_v2  ;;  %v2703_v10 = vpack.c.bf16 %v1194_v5, %v1194_v5  ;;  %v1063_v29 = vld [vmem:[#allocation3 + $0x41] sm:$0xff] }
 0x120   : > { %v2673_v11 = vpack.c.bf16 %v935_v9, %v935_v9  ;;  %v2687_v16 = vpack.c.bf16 %v1063_v29, %v1063_v29  ;;  %v1259_v31 = vld [vmem:[#allocation3 + $0x51] sm:$0xff]  ;;  %v2931_v1 = vld [vmem:[#allocation4 + $0x4] ss:$8 sps:$4 sm:$0xff]  }
 0x121   : > { %968 = vrot.lane.b32.xlu1 %v3344_v28, %s3047_s14  ;;  %745 = vst.msk [vmem:[#allocation2 + $0x70] sm:$0xff] %vm730_vm3, %v728_v6  ;;  %v711_v3 = vmax.f32 %v671_v8, 0.0  ;;  %2603 = vmatprep.mubr.msk.bf16.mxu1 %vm730_vm3, %v2931_v1 }
 0x122   : > { %1031 = vrot.lane.b32.xlu0 %v3336_v23, %s3051_s24  ;;  %862 = vst.msk [vmem:[#allocation4 + $0x28] sm:$0xf] %vm856_vm5, %v2703_v10  ;;  %1364 = vst.msk [vmem:[#allocation4 + $0x1c] sm:$0xf] %vm856_vm5, %v2673_v11 }
 0x123   : > { %v729_v12 = vmax.f32 %v711_v3, %v713_v7 }
 0x124   : > { %v759_v13 = vld [vmem:[#allocation2 + $0x60] ss:$2 sm:$0xff]  ;;  %v775_v14 = vld [vmem:[#allocation2 + $0x61] ss:$2 sm:$0xff] }
 0x125   : > { %1033 = vrot.lane.b32.xlu1 %v2679_v52, %s3051_s24  ;;  %v784_v15 = vmax.f32 %v759_v13, %v775_v14  ;;  %746 = vst.msk [vmem:[#allocation2 + $0x78] sm:$0xff] %vm730_vm3, %v729_v12 }
 0x126   : > { %1096 = vrot.lane.b32.xlu0 %v2709_v48, %s3052_s27  ;;  %v1000_v17 = vld [vmem:[#allocation3 + $0x60] sm:$0xff]  ;;  %v3441_v48 = vpop.permute.xlu1 %1237 }
 0x127   : > { %814 = vst.msk [vmem:[#allocation3 + $0x71] sm:$0xff] %vm730_vm3, %v784_v15  ;;  %v1130_v18 = vld [vmem:[#allocation3 + $0x62] sm:$0xff]  ;;  %v2681_v19 = vpack.c.bf16 %v1000_v17, %v1000_v17 }
 0x128   : > { %v2697_v20 = vpack.c.bf16 %v1130_v18, %v1130_v18  ;;  %v1065_v34 = vld [vmem:[#allocation3 + $0x61] sm:$0xff] }
 0x129   : > { %1098 = vrot.lane.b32.xlu1 %v2687_v16, %s3052_s27  ;;  %863 = vst.msk [vmem:[#allocation4 + $0x30] sm:$0xf] %vm856_vm5, %v2681_v19  ;;  %v2689_v35 = vpack.c.bf16 %v1065_v34, %v1065_v34  ;;  %v2932_v17 = vld [vmem:[#allocation4 + $0x14] ss:$8 sps:$4 sm:$0xff]  }
 0x12a   : > { %1161 = vrot.lane.b32.xlu0 %v3344_v28, %s3053_s21  ;;  %1365 = vst.msk [vmem:[#allocation4 + $0x24] sm:$0xf] %vm856_vm5, %v2697_v20  ;;  %v2711_v28 = vpack.c.bf16 %v1259_v31, %v1259_v31 }
 0x12c   : > { %v761_v21 = vld [vmem:[#allocation2 + $0x70] ss:$2 sm:$0xff]  ;;  %v777_v23 = vld [vmem:[#allocation2 + $0x71] ss:$2 sm:$0xff] }
 0x12d   : > { %1163 = vrot.lane.b32.xlu1 %v3368_v53, %s3053_s21  ;;  %v785_v24 = vmax.f32 %v761_v21, %v777_v23 }
 0x12e   : > { %1227 = vrot.lane.b32.xlu0 %v2679_v52, %s3793_s17  ;;  %v1196_v25 = vld [vmem:[#allocation3 + $0x70] sm:$0xff] }
 0x12f   : > { %v937_v26 = vld [vmem:[#allocation3 + $0x72] sm:$0xff]  ;;  %815 = vst.msk [vmem:[#allocation3 + $0x81] sm:$0xff] %vm730_vm3, %v785_v24  ;;  %v2705_v27 = vpack.c.bf16 %v1196_v25, %v1196_v25 }
 0x130   : > { %v2675_v30 = vpack.c.bf16 %v937_v26, %v937_v26  ;;  %v1261_v36 = vld [vmem:[#allocation3 + $0x71] sm:$0xff] }
 0x131   : > { %1229 = vrot.lane.b32.xlu1 %v2703_v10, %s3793_s17  ;;  %864 = vst.msk [vmem:[#allocation4 + $0x38] sm:$0xf] %vm856_vm5, %v2705_v27  ;;  %v2713_v37 = vpack.c.bf16 %v1261_v36, %v1261_v36 }
 0x132   : > { %1292 = vrot.lane.b32.xlu0 %v2687_v16, %s3054_s28  ;;  %1366 = vst.msk [vmem:[#allocation4 + $0x2c] sm:$0xf] %vm856_vm5, %v2675_v30 }
 0x135   : > { %1294 = vrot.lane.b32.xlu1 %v2711_v28, %s3054_s28 }
 0x136   : > { %905 = vrot.lane.b32.xlu0 %v2687_v16, %s3048_s16  ;;  %v1132_v32 = vld [vmem:[#allocation3 + $0x82] sm:$0xff] }
 0x137   : > { %v2699_v33 = vpack.c.bf16 %v1132_v32, %v1132_v32  ;;  %v1002_v38 = vld [vmem:[#allocation3 + $0x80] sm:$0xff] }
 0x138   : > { %v2683_v40 = vpack.c.bf16 %v1002_v38, %v1002_v38  ;;  %v1067_v42 = vld [vmem:[#allocation3 + $0x81] sm:$0xff] }
 0x139   : > { %907 = vrot.lane.b32.xlu1 %v2711_v28, %s3048_s16  ;;  %1367 = vst.msk [vmem:[#allocation4 + $0x34] sm:$0xf] %vm856_vm5, %v2699_v33  ;;  %v2691_v43 = vpack.c.bf16 %v1067_v42, %v1067_v42  ;;  %vm1678_vm5 = vcmask 1041152  }
 0x13a   : > { %970 = vrot.lane.b32.xlu0 %v3368_v53, %s3047_s14 }
 0x13d   : > { %972 = vrot.lane.b32.xlu1 %v2673_v11, %s3047_s14 }
 0x13e   : > { %1035 = vrot.lane.b32.xlu0 %v2703_v10, %s3051_s24 }
 0x141   : > { %1037 = vrot.lane.b32.xlu1 %v2681_v19, %s3051_s24 }
 0x142   : > { %1100 = vrot.lane.b32.xlu0 %v2711_v28, %s3052_s27 }
 0x145   : > { %1102 = vrot.lane.b32.xlu1 %v2689_v35, %s3052_s27 }
 0x146   : > { %1165 = vrot.lane.b32.xlu0 %v2673_v11, %s3053_s21 }
 0x149   : > { %1167 = vrot.lane.b32.xlu1 %v2697_v20, %s3053_s21 }
 0x14a   : > { %1231 = vrot.lane.b32.xlu0 %v2681_v19, %s3793_s17 }
 0x14d   : > { %1233 = vrot.lane.b32.xlu1 %v2705_v27, %s3793_s17 }
 0x14e   : > { %1296 = vrot.lane.b32.xlu0 %v2689_v35, %s3054_s28 }
 0x151   : > { %1298 = vrot.lane.b32.xlu1 %v2713_v37, %s3054_s28 }
 0x152   : > { %909 = vrot.lane.b32.xlu0 %v2689_v35, %s3048_s16 }
 0x155   : > { %911 = vrot.lane.b32.xlu1 %v2713_v37, %s3048_s16  ;;  %s323_s16 = sand.u32 1, %s3035_s10  }
 0x156   : > { %974 = vrot.lane.b32.xlu0 %v2697_v20, %s3047_s14  ;;  %s324_s29 = scalar_lea.vmem [#allocation8], %s323_s16 }
 0x159   : > { %976 = vrot.lane.b32.xlu1 %v2675_v30, %s3047_s14 }
 0x15a   : > { %1039 = vrot.lane.b32.xlu0 %v2705_v27, %s3051_s24 }
 0x15d   : > { %1041 = vrot.lane.b32.xlu1 %v2683_v40, %s3051_s24  ;;  %s2648_s24 = sshll.u32 %s3129_s13, 4 }
 0x15e   : > { %1104 = vrot.lane.b32.xlu0 %v2713_v37, %s3052_s27  ;;  %v2934_v37 = vld [vmem:[#allocation4 + $0x24] ss:$8 sps:$4 sm:$0xff]   ;;  %s2415_s22 = scalar_lea.hbm %s3792_s9, %s2648_s24 }
 0x161   : > { %1106 = vrot.lane.b32.xlu1 %v2691_v43, %s3052_s27 }
 0x162   : > { %1169 = vrot.lane.b32.xlu0 %v2675_v30, %s3053_s21 }
 0x165   : > { %1171 = vrot.lane.b32.xlu1 %v2699_v33, %s3053_s21  ;;  %s2417_s21 = sshll.u32 %s324_s29, 4  ;;  %s2418_s21 = int_to_ptr.vmem [resolvable:$true] %s2417_s21 }
 0x166   : > { %1235 = vrot.lane.b32.xlu0 %v2683_v40, %s3793_s17  ;;  %s2405_s17 = scalar_lea.sflag [#allocation9], %s323_s16  ;;  %s2983_s23 = scalar_lea.vmem %s2418_s21, 16 }
 0x167   : > { %p2984_p11 = scmp.ne.s32.totalorder %s2418_s21, %s2983_s23 }
 0x169   : > { %1302 = vrot.lane.b32.xlu1 %v2715_v45, %s3054_s28  ;;  %p2985_p12 = pnand %p2984_p11, %p3146_p5 }
 0x16a   : > { %1300 = vrot.lane.b32.xlu0 %v2691_v43, %s3054_s28 }
 0x16b   : > { %p2986_p13 = pneg %p2985_p12 }
 0x173   : > { %v965_v46 = vpop.permute.xlu1 %964 }
 0x174   : > { %v900_v47 = vpop.permute.xlu0 %899 }
 0x175   : > { %923 = vst.msk [vmem:[#allocation4 + $0x8] sm:$0xf] %vm921_vm6, %v900_v47  ;;  %v2936_v47 = vld [vmem:[#allocation4 + $0x34] ss:$8 sps:$4 sm:$0xff]  }
 0x176   : > { %988 = vst.msk [vmem:[#allocation4 + $0x8] sm:$0xf] %vm986_vm7, %v965_v46 }
 0x178   : > { %v1028_v49 = vpop.permute.xlu0 %1027 }
 0x179   : > { %1052 = vst.msk [vmem:[#allocation4] sm:$0xf] %vm1051_vm8, %v1028_v49 }
 0x17b   : > { %v1030_v50 = vpop.permute.xlu1 %1029 }
 0x17c   : > { %v1093_v51 = vpop.permute.xlu0 %1092  ;;  %1053 = vst.msk [vmem:[#allocation4 + $0x8] sm:$0xf] %vm1051_vm8, %v1030_v50  ;;  %v3505_v50 = vld [vmem:[%s3787_s4] ss:$0 sm:$0xff] }
 0x17d   : > { %1117 = vst.msk [vmem:[#allocation4] sm:$0xf] %vm1116_vm9, %v1093_v51 }
 0x17f   : > { %v1095_v52 = vpop.permute.xlu1 %1094 }
 0x180   : > { %v1158_v53 = vpop.permute.xlu0 %1157  ;;  %1118 = vst.msk [vmem:[#allocation4 + $0x8] sm:$0xf] %vm1116_vm9, %v1095_v52 }
 0x181   : > { %1182 = vst.msk [vmem:[#allocation4] sm:$0xf] %vm1181_vm10, %v1158_v53 }
 0x183   : > { %v1160_v54 = vpop.permute.xlu1 %1159 }
 0x184   : > { %v1224_v55 = vpop.permute.xlu0 %1223  ;;  %1183 = vst.msk [vmem:[#allocation4 + $0x8] sm:$0xf] %vm1181_vm10, %v1160_v54 }
 0x185   : > { %1248 = vst.msk [vmem:[#allocation4] sm:$0xf] %vm1247_vm11, %v1224_v55 }
 0x187   : > { %v1226_v56 = vpop.permute.xlu1 %1225 }
 0x188   : > { %v1289_v57 = vpop.permute.xlu0 %1288  ;;  %1249 = vst.msk [vmem:[#allocation4 + $0x8] sm:$0xf] %vm1247_vm11, %v1226_v56 }
 0x189   : > { %1313 = vst.msk [vmem:[#allocation4] sm:$0xf] %vm1312_vm12, %v1289_v57 }
 0x18b   : > { %v1291_v58 = vpop.permute.xlu1 %1290 }
 0x18c   : > { %v902_v59 = vpop.permute.xlu0 %901  ;;  %1314 = vst.msk [vmem:[#allocation4 + $0x8] sm:$0xf] %vm1312_vm12, %v1291_v58 }
 0x18d   : > { %924 = vst.msk [vmem:[#allocation4 + $0x10] sm:$0xf] %vm921_vm6, %v902_v59 }
 0x18f   : > { %v904_v60 = vpop.permute.xlu1 %903 }
 0x190   : > { %v967_v61 = vpop.permute.xlu0 %966  ;;  %925 = vst.msk [vmem:[#allocation4 + $0x18] sm:$0xf] %vm921_vm6, %v904_v60 }
 0x191   : > { %989 = vst.msk [vmem:[#allocation4 + $0x10] sm:$0xf] %vm986_vm7, %v967_v61 }
 0x193   : > { %v969_v62 = vpop.permute.xlu1 %968  ;;  %v2929_v0 = vld [vmem:[#allocation4] ss:$8 sps:$4 sm:$0xff]  }
 0x194   : > { %v1032_v63 = vpop.permute.xlu0 %1031  ;;  %990 = vst.msk [vmem:[#allocation4 + $0x18] sm:$0xf] %vm986_vm7, %v969_v62  ;;  %1537 = vmatmul.mubr.bf16.vlgmr.msra.gmra.mxu1 %v2929_v0 }
 0x195   : > { %1054 = vst.msk [vmem:[#allocation4 + $0x10] sm:$0xf] %vm1051_vm8, %v1032_v63  ;;  %2604 = vmatprep.mubr.msk.bf16.mxu1 %vm730_vm3, %v2932_v17  ;;  %v2943_v17 = vld [vmem:[%s3788_s5 + $0xe8] sm:$0xff]  }
 0x197   : > { %v1034_v2 = vpop.permute.xlu1 %1033 }
 0x198   : > { %v1097_v4 = vpop.permute.xlu0 %1096  ;;  %1055 = vst.msk [vmem:[#allocation4 + $0x18] sm:$0xf] %vm1051_vm8, %v1034_v2 }
 0x199   : > { %1119 = vst.msk [vmem:[#allocation4 + $0x10] sm:$0xf] %vm1116_vm9, %v1097_v4 }
 0x19b   : > { %v1099_v5 = vpop.permute.xlu1 %1098 }
 0x19c   : > { %v1162_v6 = vpop.permute.xlu0 %1161  ;;  %1120 = vst.msk [vmem:[#allocation4 + $0x18] sm:$0xf] %vm1116_vm9, %v1099_v5 }
 0x19d   : > { %1184 = vst.msk [vmem:[#allocation4 + $0x10] sm:$0xf] %vm1181_vm10, %v1162_v6 }
 0x19f   : > { %v1164_v7 = vpop.permute.xlu1 %1163 }
 0x1a0   : > { %v1228_v8 = vpop.permute.xlu0 %1227  ;;  %1185 = vst.msk [vmem:[#allocation4 + $0x18] sm:$0xf] %vm1181_vm10, %v1164_v7 }
 0x1a1   : > { %1250 = vst.msk [vmem:[#allocation4 + $0x10] sm:$0xf] %vm1247_vm11, %v1228_v8  ;;  %v3055_v8 = vmov 1966171168  }
 0x1a3   : > { %v1230_v9 = vpop.permute.xlu1 %1229 }
 0x1a4   : > { %v1293_v10 = vpop.permute.xlu0 %1292  ;;  %1251 = vst.msk [vmem:[#allocation4 + $0x18] sm:$0xf] %vm1247_vm11, %v1230_v9  ;;  %v1610_v9 = vunpack.c.l.s4 %v3055_v8 }
 0x1a5   : > { %1315 = vst.msk [vmem:[#allocation4 + $0x10] sm:$0xf] %vm1312_vm12, %v1293_v10  ;;  %v1612_v10 = vlaneseq }
 0x1a7   : > { %v1295_v11 = vpop.permute.xlu1 %1294 }
 0x1a8   : > { %v906_v3 = vpop.permute.xlu0 %905  ;;  %1316 = vst.msk [vmem:[#allocation4 + $0x18] sm:$0xf] %vm1312_vm12, %v1295_v11  ;;  %v1611_v11 = vunpack.c.0.s8 %v1610_v9 }
 0x1a9   : > { %926 = vst.msk [vmem:[#allocation4 + $0x20] sm:$0xf] %vm921_vm6, %v906_v3  ;;  %v1613_v3 = vshrl.u32 %v1612_v10, 7 }
 0x1ab   : > { %v908_v12 = vpop.permute.xlu1 %907 }
 0x1ac   : > { %v971_v29 = vpop.permute.xlu0 %970  ;;  %927 = vst.msk [vmem:[#allocation4 + $0x28] sm:$0xf] %vm921_vm6, %v908_v12  ;;  %v1371_v15 = vld [vmem:[#allocation4 + $0x10] sm:$0xff]  ;;  %v2939_v12 = vld [vmem:[%s3788_s5 + $0xf8] sm:$0xff]  }
 0x1ad   : > { %991 = vst.msk [vmem:[#allocation4 + $0x20] sm:$0xf] %vm986_vm7, %v971_v29  ;;  %v2940_v29 = vld [vmem:[%s3788_s5 + $0xb8] sm:$0xff]   ;;  %2764 = vmatprep.subr.bf16.mxu0 %v2939_v12  ;;  %v1764_v12 = vld [vmem:[#allocation7 + $0x2] sm:$0x1] }
 0x1ae   : > { %2765 = vmatpush3.bf16.msra.mxu0 %v2940_v29 }
 0x1af   : > { %v973_v13 = vpop.permute.xlu1 %972  ;;  %v1372_v16 = vld [vmem:[#allocation4 + $0x18] sm:$0xff] }
 0x1b0   : > { %v1036_v14 = vpop.permute.xlu0 %1035  ;;  %992 = vst.msk [vmem:[#allocation4 + $0x28] sm:$0xf] %vm986_vm7, %v973_v13  ;;  %v2588_v18 = vcombine.low %v1371_v15, %v1372_v16  ;;  %v2941_v13 = vld [vmem:[%s3788_s5 + $0xf0] sm:$0xff]   ;;  %v3529_v16 = vsub.s32 %v1611_v11, %v1613_v3 }
 0x1b1   : > { %1056 = vst.msk [vmem:[#allocation4 + $0x20] sm:$0xf] %vm1051_vm8, %v1036_v14  ;;  %v2947_v14 = vld [vmem:[%s3788_s5 + $0x78] sm:$0xff]   ;;  %v2942_v15 = vld [vmem:[%s3788_s5 + $0xb0] sm:$0xff]   ;;  %2766 = vmatprep.subr.bf16.mxu0 %v2941_v13 }
 0x1b2   : > { %1545 = vmatmul.mubr.bf16.gmra.mxu1 %v2588_v18  ;;  %2742 = vmatprep.subr.bf16.mxu1 %v2947_v14  ;;  %v1842_v3 = vld [vmem:[#allocation7 + $0x3] sm:$0x1] }
 0x1b3   : > { %v1038_v19 = vpop.permute.xlu1 %1037  ;;  %2605 = vmatprep.mubr.msk.bf16.mxu1 %vm730_vm3, %v2934_v37  ;;  %2767 = vmatpush3.bf16.msra.mxu0 %v2942_v15 }
 0x1b4   : > { %v1101_v20 = vpop.permute.xlu0 %1100  ;;  %1057 = vst.msk [vmem:[#allocation4 + $0x28] sm:$0xf] %vm1051_vm8, %v1038_v19  ;;  %2768 = vmatprep.subr.bf16.mxu0 %v2943_v17 }
 0x1b5   : > { %1121 = vst.msk [vmem:[#allocation4 + $0x20] sm:$0xf] %vm1116_vm9, %v1101_v20 }
 0x1b7   : > { %v1103_v21 = vpop.permute.xlu1 %1102 }
 0x1b8   : > { %v1166_v23 = vpop.permute.xlu0 %1165  ;;  %1122 = vst.msk [vmem:[#allocation4 + $0x28] sm:$0xf] %vm1116_vm9, %v1103_v21 }
 0x1b9   : > { %1186 = vst.msk [vmem:[#allocation4 + $0x20] sm:$0xf] %vm1181_vm10, %v1166_v23 }
 0x1bb   : > { %v1168_v24 = vpop.permute.xlu1 %1167 }
 0x1bc   : > { %v1232_v25 = vpop.permute.xlu0 %1231  ;;  %1187 = vst.msk [vmem:[#allocation4 + $0x28] sm:$0xf] %vm1181_vm10, %v1168_v24 }
 0x1bd   : > { %1252 = vst.msk [vmem:[#allocation4 + $0x20] sm:$0xf] %vm1247_vm11, %v1232_v25  ;;  %v2944_v25 = vld [vmem:[%s3788_s5 + $0xa8] sm:$0xff]  }
 0x1be   : > { %2769 = vmatpush3.bf16.msra.mxu0 %v2944_v25  ;;  %v2954_v25 = vld [vmem:[%s3788_s5 + $0x28] sm:$0xff]  }
 0x1bf   : > { %v1234_v26 = vpop.permute.xlu1 %1233 }
 0x1c0   : > { %v1297_v27 = vpop.permute.xlu0 %1296  ;;  %1253 = vst.msk [vmem:[#allocation4 + $0x28] sm:$0xf] %vm1247_vm11, %v1234_v26 }
 0x1c1   : > { %1317 = vst.msk [vmem:[#allocation4 + $0x20] sm:$0xf] %vm1312_vm12, %v1297_v27 }
 0x1c3   : > { %v1299_v30 = vpop.permute.xlu1 %1298 }
 0x1c4   : > { %v910_v31 = vpop.permute.xlu0 %909  ;;  %1318 = vst.msk [vmem:[#allocation4 + $0x28] sm:$0xf] %vm1312_vm12, %v1299_v30 }
 0x1c5   : > { %928 = vst.msk [vmem:[#allocation4 + $0x30] sm:$0xf] %vm921_vm6, %v910_v31  ;;  %v2959_v31 = vld [vmem:[%s3788_s5 + $0x58] sm:$0xff]  }
 0x1c7   : > { %v912_v28 = vpop.permute.xlu1 %911 }
 0x1c8   : > { %v975_v32 = vpop.permute.xlu0 %974  ;;  %929 = vst.msk [vmem:[#allocation4 + $0x38] sm:$0xf] %vm921_vm6, %v912_v28  ;;  %v1373_v35 = vld [vmem:[#allocation4 + $0x20] sm:$0xff]  ;;  %v1686_v28 = vld [vmem:[#allocation7 + $0x1] sm:$0x1]  ;;  %vm3697_vm6 = vmand %vm1678_vm5, %vm1600_vm15 }
 0x1c9   : > { %993 = vst.msk [vmem:[#allocation4 + $0x30] sm:$0xf] %vm986_vm7, %v975_v32 }
 0x1cb   : > { %v977_v33 = vpop.permute.xlu1 %976  ;;  %v1374_v36 = vld [vmem:[#allocation4 + $0x28] sm:$0xff] }
 0x1cc   : > { %v1040_v34 = vpop.permute.xlu0 %1039  ;;  %994 = vst.msk [vmem:[#allocation4 + $0x38] sm:$0xf] %vm986_vm7, %v977_v33  ;;  %v2590_v38 = vcombine.low %v1373_v35, %v1374_v36  ;;  %v2945_v36 = vld [vmem:[%s3788_s5 + $0xe0] sm:$0xff]   ;;  %vm3056_vm7 = vmmov 0  }
 0x1cd   : > { %1058 = vst.msk [vmem:[#allocation4 + $0x30] sm:$0xf] %vm1051_vm8, %v1040_v34  ;;  %2770 = vmatprep.subr.bf16.mxu0 %v2945_v36 }
 0x1ce   : > { %1553 = vmatmul.mubr.bf16.gmra.mxu1 %v2590_v38 }
 0x1cf   : > { %v1042_v39 = vpop.permute.xlu1 %1041  ;;  %2606 = vmatprep.mubr.msk.bf16.mxu1 %vm730_vm3, %v2936_v47  ;;  %vm1652_vm3 = vcmask 778752  }
 0x1d0   : > { %v1105_v40 = vpop.permute.xlu0 %1104  ;;  %1059 = vst.msk [vmem:[#allocation4 + $0x38] sm:$0xf] %vm1051_vm8, %v1042_v39  ;;  %vm3684_vm4 = vmand %vm1652_vm3, %vm1600_vm15  ;;  %vm2391_vm8 = vcmask 1040384  }
 0x1d1   : > { %1123 = vst.msk [vmem:[#allocation4 + $0x30] sm:$0xf] %vm1116_vm9, %v1105_v40 }
 0x1d3   : > { %v1107_v41 = vpop.permute.xlu1 %1106 }
 0x1d4   : > { %v1170_v42 = vpop.permute.xlu0 %1169  ;;  %1124 = vst.msk [vmem:[#allocation4 + $0x38] sm:$0xf] %vm1116_vm9, %v1107_v41 }
 0x1d5   : > { %1188 = vst.msk [vmem:[#allocation4 + $0x30] sm:$0xf] %vm1181_vm10, %v1170_v42  ;;  %v1602_v42 = vld [vmem:[#allocation7] sm:$0x1] }
 0x1d7   : > { %v1172_v43 = vpop.permute.xlu1 %1171 }
 0x1d8   : > { %v1236_v44 = vpop.permute.xlu0 %1235  ;;  %1189 = vst.msk [vmem:[#allocation4 + $0x38] sm:$0xf] %vm1181_vm10, %v1172_v43  ;;  %v2946_v43 = vld [vmem:[%s3788_s5 + $0xa0] sm:$0xff]  }
 0x1d9   : > { %1254 = vst.msk [vmem:[#allocation4 + $0x30] sm:$0xf] %vm1247_vm11, %v1236_v44  ;;  %1255 = vst.msk [vmem:[#allocation4 + $0x38] sm:$0xf] %vm1247_vm11, %v3441_v48  ;;  %2771 = vmatpush3.bf16.msra.mxu0 %v2946_v43 }
 0x1db   : > { %v1303_v45 = vpop.permute.xlu1 %1302 }
 0x1dc   : > { %v1301_v46 = vpop.permute.xlu0 %1300  ;;  %1320 = vst.msk [vmem:[#allocation4 + $0x38] sm:$0xf] %vm1312_vm12, %v1303_v45 }
 0x1dd   : > { %1319 = vst.msk [vmem:[#allocation4 + $0x30] sm:$0xf] %vm1312_vm12, %v1301_v46 }
 0x1e4   : > { %v2938_v49 = vld [vmem:[#allocation4 + $0x30] ss:$8 sps:$4 sm:$0xff]  }
 0x1e5   : > { %1561 = vmatmul.mubr.bf16.gmra.mxu1 %v2938_v49 }
 0x254   : > { %v1538_v51 = vpop.f32.mrf.mxu1 }
 0x255   : > { %v1539_v48 = vadd.f32 %v3505_v50, %v1538_v51 }
 0x256   : > { %v1540_v52 = vpop.f32.mrf.mxu1 }
 0x257   : > { %v1569_v56 = vmax.f32 %v1539_v48, 0.0 }
 0x258   : > { %v1541_v53 = vpop.f32.mrf.mxu1 }
 0x259   : > { %v1542_v54 = vadd.f32 %v3505_v50, %v1541_v53 }
 0x25a   : > { %v1543_v55 = vpop.f32.mrf.mxu1 }
 0x25b   : > { %v1570_v57 = vmax.f32 %v1542_v54, 0.0 }
 0x25d   : > { %v1577_v58 = vmax.f32 %v1569_v56, %v1570_v57 }
 0x25f   : > { %1582 = vst.msk [vmem:[#allocation5] sm:$0xff] %vm1581_vm13, %v1577_v58 }
 0x272   : > { %v1546_v59 = vpop.f32.mrf.mxu1 }
 0x273   : > { %v1547_v61 = vadd.f32 %v3505_v50, %v1546_v59 }
 0x274   : > { %v1548_v60 = vpop.f32.mrf.mxu1 }
 0x275   : > { %v1571_v1 = vmax.f32 %v1547_v61, 0.0 }
 0x276   : > { %v1549_v62 = vpop.f32.mrf.mxu1 }
 0x277   : > { %v1550_v63 = vadd.f32 %v3505_v50, %v1549_v62  ;;  %v2948_v62 = vld [vmem:[%s3788_s5 + $0x38] sm:$0xff]  }
 0x278   : > { %v1551_v0 = vpop.f32.mrf.mxu1  ;;  %2743 = vmatpush3.bf16.msra.mxu1 %v2948_v62 }
 0x279   : > { %v1572_v2 = vmax.f32 %v1550_v63, 0.0  ;;  %v2949_v63 = vld [vmem:[%s3788_s5 + $0xd8] sm:$0xff]   ;;  %v2951_v0 = vld [vmem:[%s3788_s5 + $0x70] sm:$0xff]  }
 0x27a   : > { %2772 = vmatprep.subr.bf16.mxu0 %v2949_v63  ;;  %2744 = vmatprep.subr.bf16.mxu1 %v2951_v0  ;;  %v2968_v0 = vld [vmem:[%s3788_s5 + $0x80] sm:$0xff]  }
 0x27b   : > { %v1578_v4 = vmax.f32 %v1571_v1, %v1572_v2 }
 0x27d   : > { %1583 = vst.msk [vmem:[#allocation5 + $0x8] sm:$0xff] %vm1581_vm13, %v1578_v4  ;;  %v2952_v4 = vld [vmem:[%s3788_s5 + $0x30] sm:$0xff]  }
 0x27e   : > { %2745 = vmatpush3.bf16.msra.mxu1 %v2952_v4 }
 0x284   : > { %v1586_v5 = vld [vmem:[#allocation5] ss:$2 sm:$0xff]  ;;  %v1590_v6 = vld [vmem:[#allocation5 + $0x1] ss:$2 sm:$0xff] }
 0x285   : > { %v1593_v7 = vmax.f32 %v1586_v5, %v1590_v6  ;;  %v2953_v5 = vld [vmem:[%s3788_s5 + $0x68] sm:$0xff]  }
 0x286   : > { %2746 = vmatprep.subr.bf16.mxu1 %v2953_v5  ;;  %v2969_v5 = vld [vmem:[%s3788_s5 + $0x40] sm:$0xff]  }
 0x287   : > { %1595 = vst.msk [vmem:[#allocation6] sm:$0xff] %vm1581_vm13, %v1593_v7  ;;  %2747 = vmatpush3.bf16.msra.mxu1 %v2954_v25 }
 0x28e   : > { %v1554_v18 = vpop.f32.mrf.mxu1  ;;  %v1690_v19 = vld [vmem:[#allocation6 + $0x5] ss:$16 sm:$0x1]  ;;  %v1606_v20 = vld [vmem:[#allocation6 + $0x1] ss:$16 sm:$0x1] }
 0x28f   : > { %v1691_v21 = vpack.c.bf16 %v1690_v19, %v1690_v19  ;;  %v1607_v23 = vpack.c.bf16 %v1606_v20, %v1606_v20  ;;  %v1555_v26 = vadd.f32 %v3505_v50, %v1554_v18  ;;  %v1684_v32 = vld [vmem:[#allocation6 + $0x4] ss:$16 sm:$0x1]  ;;  %v1597_v35 = vld [vmem:[#allocation6] ss:$16 sm:$0x1] }
 0x290   : > { %v1556_v24 = vpop.f32.mrf.mxu1  ;;  %v1685_v34 = vpack.c.bf16 %v1684_v32, %v1684_v32  ;;  %v1598_v46 = vpack.c.bf16 %v1597_v35, %v1597_v35  ;;  %v1714_v1 = vld [vmem:[#allocation6 + $0x6] ss:$16 sm:$0x1]  ;;  %v1632_v2 = vld [vmem:[#allocation6 + $0x2] ss:$16 sm:$0x1] }
 0x291   : > { %v1699_v27 = vrot.slane %v1691_v21, %v3529_v16  ;;  %v1615_v30 = vrot.slane %v1607_v23, %v3529_v16  ;;  %v1573_v44 = vmax.f32 %v1555_v26, 0.0  ;;  %v1715_v8 = vpack.c.bf16 %v1714_v1, %v1714_v1  ;;  %v1738_v21 = vld [vmem:[#allocation6 + $0x7] ss:$16 sm:$0x1]  ;;  %v2955_v26 = vld [vmem:[%s3788_s5 + $0xd0] sm:$0xff]   ;;  %v2966_v1 = vld [vmem:[%s3788_s5 + $0x8] sm:$0xff]  }
 0x292   : > { %v1557_v33 = vpop.f32.mrf.mxu1  ;;  %v1687_v41 = vsel %vm3542_vm0, %v1685_v34, %v1686_v28  ;;  %v1603_v49 = vsel %vm3542_vm0, %v1598_v46, %v1602_v42  ;;  %v1633_v9 = vpack.c.bf16 %v1632_v2, %v1632_v2  ;;  %v2956_v34 = vld [vmem:[%s3788_s5 + $0x90] sm:$0xff]   ;;  %v2957_v35 = vld [vmem:[%s3788_s5 + $0x60] sm:$0xff]  }
 0x293   : > { %v1558_v37 = vadd.f32 %v3505_v50, %v1557_v33  ;;  %v1706_v38 = vrot.slane %v1699_v27, %v3529_v16  ;;  %v1622_v39 = vrot.slane %v1615_v30, %v3529_v16  ;;  %1688 = vst [vmem:[#allocation7 + $0x1] sm:$0x1] %v1687_v41  ;;  %1604 = vst [vmem:[#allocation7] sm:$0x1] %v1603_v49  ;;  %2748 = vmatprep.subr.bf16.mxu1 %v2957_v35 }
 0x294   : > { %v1559_v40 = vpop.f32.mrf.mxu1  ;;  %v1723_v19 = vrot.slane %v1715_v8, %v3529_v16  ;;  %v1641_v20 = vrot.slane %v1633_v9, %v3529_v16  ;;  %v1658_v33 = vld [vmem:[#allocation6 + $0x3] ss:$16 sm:$0x1] }
 0x295   : > { %v1574_v45 = vmax.f32 %v1558_v37, 0.0  ;;  %1707 = vrot.lane.b32.xlu1 %v1706_v38, %s3047_s14  ;;  %1623 = vrot.lane.b32.xlu0 %v1622_v39, %s3047_s14  ;;  %v1739_v38 = vpack.c.bf16 %v1738_v21, %v1738_v21  ;;  %v1659_v39 = vpack.c.bf16 %v1658_v33, %v1658_v33  ;;  %v2958_v40 = vld [vmem:[%s3788_s5 + $0x20] sm:$0xff]  }
 0x296   : > { %v1730_v41 = vrot.slane %v1723_v19, %v3529_v16  ;;  %v1648_v42 = vrot.slane %v1641_v20, %v3529_v16  ;;  %2749 = vmatpush3.bf16.msra.mxu1 %v2958_v40 }
 0x297   : > { %v1579_v47 = vmax.f32 %v1573_v44, %v1574_v45  ;;  %v1667_v49 = vrot.slane %v1659_v39, %v3529_v16  ;;  %2750 = vmatprep.subr.bf16.mxu1 %v2959_v31 }
 0x299   : > { %1584 = vst.msk [vmem:[#allocation5 + $0x10] sm:$0xff] %vm1581_vm13, %v1579_v47  ;;  %v1747_v47 = vrot.slane %v1739_v38, %v3529_v16 }
 0x29a   : > { %v1710_v9 = vld [vmem:[#allocation7 + $0x1] sm:$0x1] }
 0x2a5   : > { %v1562_v51 = vpop.f32.mrf.mxu1 }
 0x2a6   : > { %v1563_v48 = vadd.f32 %v3505_v50, %v1562_v51 }
 0x2a7   : > { %v1564_v52 = vpop.f32.mrf.mxu1 }
 0x2a8   : > { %v1575_v56 = vmax.f32 %v1563_v48, 0.0 }
 0x2a9   : > { %v1565_v53 = vpop.f32.mrf.mxu1 }
 0x2aa   : > { %v1566_v54 = vadd.f32 %v3505_v50, %v1565_v53  ;;  %v2950_v50 = vld [vmem:[%s3788_s5 + $0x98] sm:$0xff]  }
 0x2ab   : > { %v1567_v55 = vpop.f32.mrf.mxu1  ;;  %2773 = vmatpush3.bf16.msra.mxu0 %v2950_v50  ;;  %v2965_v50 = vld [vmem:[%s3788_s5 + $0x48] sm:$0xff]  }
 0x2ac   : > { %v1576_v57 = vmax.f32 %v1566_v54, 0.0  ;;  %2774 = vmatprep.subr.bf16.mxu0 %v2955_v26  ;;  %v2960_v54 = vld [vmem:[%s3788_s5 + $0x18] sm:$0xff]   ;;  %v2961_v55 = vld [vmem:[%s3788_s5 + $0xc8] sm:$0xff]  }
 0x2ad   : > { %2751 = vmatpush3.bf16.msra.mxu1 %v2960_v54 }
 0x2ae   : > { %v1580_v58 = vmax.f32 %v1575_v56, %v1576_v57  ;;  %v2962_v56 = vld [vmem:[%s3788_s5 + $0x88] sm:$0xff]   ;;  %v2963_v57 = vld [vmem:[%s3788_s5 + $0x50] sm:$0xff]  }
 0x2af   : > { %2775 = vmatpush3.bf16.msra.mxu0 %v2956_v34  ;;  %2752 = vmatprep.subr.bf16.mxu1 %v2963_v57  ;;  %v2975_v57 = vld [vmem:[%s3790_s7 + $0x18] sm:$0xff]  }
 0x2b0   : > { %1585 = vst.msk [vmem:[#allocation5 + $0x18] sm:$0xff] %vm1581_vm13, %v1580_v58  ;;  %v1754_v58 = vrot.slane %v1747_v47, %v3529_v16  ;;  %2776 = vmatprep.subr.bf16.mxu0 %v2961_v55  ;;  %v2972_v55 = vld [vmem:[%s3790_s7 + $0x30] sm:$0xff]  }
 0x2b3   : > { %2777 = vmatpush3.bf16.msra.mxu0 %v2962_v56  ;;  %v2974_v56 = vld [vmem:[%s3790_s7 + $0x20] sm:$0xff]  }
 0x2b7   : > { %v1588_v59 = vld [vmem:[#allocation5 + $0x10] ss:$2 sm:$0xff]  ;;  %v1592_v60 = vld [vmem:[#allocation5 + $0x11] ss:$2 sm:$0xff] }
 0x2b8   : > { %v1594_v61 = vmax.f32 %v1588_v59, %v1592_v60  ;;  %v2964_v59 = vld [vmem:[%s3788_s5 + $0x10] sm:$0xff]   ;;  %v2967_v60 = vld [vmem:[%s3788_s5 + $0xc0] sm:$0xff]  }
 0x2b9   : > { %2778 = vmatprep.subr.bf16.mxu0 %v2967_v60  ;;  %2753 = vmatpush3.bf16.msra.mxu1 %v2964_v59  ;;  %v2977_v59 = vld [vmem:[%s3790_s7 + $0x8] sm:$0xff]   ;;  %v2978_v60 = vld [vmem:[%s3790_s7] sm:$0xff]  }
 0x2ba   : > { %1596 = vst.msk [vmem:[#allocation6 + $0x8] sm:$0xff] %vm1581_vm13, %v1594_v61  ;;  %v1674_v61 = vrot.slane %v1667_v49, %v3529_v16  ;;  %2754 = vmatprep.subr.bf16.mxu1 %v2965_v50  ;;  %2779 = vmatpush3.bf16.msra.mxu0 %v2968_v0 }
 0x2bd   : > { %2755 = vmatpush3.bf16.msra.mxu1 %v2966_v1 }
 0x2be   : > { %2756 = vmatprep.subr.bf16.mxu1 %v2969_v5 }
 0x2c1   : > { %v1846_v6 = vld [vmem:[#allocation6 + $0xd] ss:$16 sm:$0x1]  ;;  %v1768_v7 = vld [vmem:[#allocation6 + $0x9] ss:$16 sm:$0x1] }
 0x2c2   : > { %v1847_v10 = vpack.c.bf16 %v1846_v6, %v1846_v6  ;;  %v1769_v11 = vpack.c.bf16 %v1768_v7, %v1768_v7  ;;  %v1870_v29 = vld [vmem:[#allocation6 + $0xe] ss:$16 sm:$0x1]  ;;  %v1792_v13 = vld [vmem:[#allocation6 + $0xa] ss:$16 sm:$0x1] }
 0x2c3   : > { %v1840_v17 = vld [vmem:[#allocation6 + $0xc] ss:$16 sm:$0x1]  ;;  %v1762_v18 = vld [vmem:[#allocation6 + $0x8] ss:$16 sm:$0x1]  ;;  %v1871_v28 = vpack.c.bf16 %v1870_v29, %v1870_v29  ;;  %v1793_v32 = vpack.c.bf16 %v1792_v13, %v1792_v13 }
 0x2c4   : > { %v1855_v14 = vrot.slane %v1847_v10, %v3529_v16  ;;  %v1777_v15 = vrot.slane %v1769_v11, %v3529_v16  ;;  %v1841_v23 = vpack.c.bf16 %v1840_v17, %v1840_v17  ;;  %v1763_v24 = vpack.c.bf16 %v1762_v18, %v1762_v18  ;;  %v1894_v45 = vld [vmem:[#allocation6 + $0xf] ss:$16 sm:$0x1]  ;;  %v1816_v46 = vld [vmem:[#allocation6 + $0xb] ss:$16 sm:$0x1] }
 0x2c5   : > { %v1879_v43 = vrot.slane %v1871_v28, %v3529_v16  ;;  %v1801_v44 = vrot.slane %v1793_v32, %v3529_v16  ;;  %v1895_v48 = vpack.c.bf16 %v1894_v45, %v1894_v45  ;;  %v1817_v53 = vpack.c.bf16 %v1816_v46, %v1816_v46  ;;  %v2970_v6 = vld [vmem:[%s3788_s5] sm:$0xff]   ;;  %v1628_v11 = vld [vmem:[#allocation7] sm:$0x1] }
 0x2c6   : > { %v1862_v27 = vrot.slane %v1855_v14, %v3529_v16  ;;  %v1784_v30 = vrot.slane %v1777_v15, %v3529_v16  ;;  %v1843_v36 = vsel %vm3542_vm0, %v1841_v23, %v1842_v3  ;;  %v1765_v37 = vsel %vm3542_vm0, %v1763_v24, %v1764_v12  ;;  %2757 = vmatpush3.bf16.msra.mxu1 %v2970_v6 }
 0x2c7   : > { %1844 = vst [vmem:[#allocation7 + $0x3] sm:$0x1] %v1843_v36  ;;  %1766 = vst [vmem:[#allocation7 + $0x2] sm:$0x1] %v1765_v37  ;;  %v1886_v51 = vrot.slane %v1879_v43, %v3529_v16  ;;  %v1808_v52 = vrot.slane %v1801_v44, %v3529_v16  ;;  %v1903_v62 = vrot.slane %v1895_v48, %v3529_v16  ;;  %2831 = vmatprep.subr.bf16.mxu1 %v3046_v22  ;;  %v2971_v48 = vld [vmem:[%s3790_s7 + $0x38] sm:$0xff]  }
 0x2c8   : > { %1863 = vrot.lane.b32.xlu1 %v1862_v27, %s3047_s14  ;;  %1785 = vrot.lane.b32.xlu0 %v1784_v30, %s3047_s14  ;;  %v1825_v63 = vrot.slane %v1817_v53, %v3529_v16 }
 0x2c9   : > { %v1910_v2 = vrot.slane %v1903_v62, %v3529_v16  ;;  %v1982_v62 = vld [vmem:[%s3789_s6] sm:$0x1] }
 0x2ca   : > { %v1832_v4 = vrot.slane %v1825_v63, %v3529_v16 }
 0x2cc   : > { %1731 = vrot.lane.b32.xlu1 %v1730_v41, %s3052_s27  ;;  %1649 = vrot.lane.b32.xlu0 %v1648_v42, %s3052_s27 }
 0x2ce   : > { %v1866_v29 = vld [vmem:[#allocation7 + $0x3] sm:$0x1]  ;;  %v1788_v14 = vld [vmem:[#allocation7 + $0x2] sm:$0x1] }
 0x2d0   : > { %1887 = vrot.lane.b32.xlu1 %v1886_v51, %s3052_s27  ;;  %1809 = vrot.lane.b32.xlu0 %v1808_v52, %s3052_s27 }
 0x2d4   : > { %1755 = vrot.lane.b32.xlu1 %v1754_v58, %s3799_s25  ;;  %1675 = vrot.lane.b32.xlu0 %v1674_v61, %s3799_s25  ;;  %v2976_v58 = vld [vmem:[%s3790_s7 + $0x10] sm:$0xff]  }
 0x2d8   : > { %1911 = vrot.lane.b32.xlu1 %v1910_v2, %s3799_s25  ;;  %1833 = vrot.lane.b32.xlu0 %v1832_v4, %s3799_s25  ;;  %s3057_s25 = smov [#allocation8]  }
 0x2d9   : > { %s2987_s26 = sshll.u32 %s3057_s25, 4  ;;  %s2988_s26 = int_to_ptr.vmem [resolvable:$false] %s2987_s26 }
 0x2da   : > { %s2989_s13 = scalar_lea.vmem %s2988_s26, 32  ;;  %p2990_p0 = scmp.lt.s32.totalorder %s2418_s21, %s2988_s26 }
 0x2db   : > { %p2991_p1 = scmp.lt.s32.totalorder %s2989_s13, %s2983_s23 }
 0x2dd   : > { %p2992_p2 = por %p2991_p1, %p2990_p0 }
 0x2df   : > { %p2993_p3 = pnand %p2992_p2, %p2986_p13 }
 0x307   : > { %v1708_v8 = vpop.permute.xlu1 %1707  ;;  %v1624_v10 = vpop.permute.xlu0 %1623 }
 0x308   : > { %v1711_v3 = vsel %vm3671_vm2, %v1708_v8, %v1710_v9  ;;  %v1629_v12 = vsel %vm3671_vm2, %v1624_v10, %v1628_v11 }
 0x309   : > { %1712 = vst [vmem:[#allocation7 + $0x1] sm:$0x1] %v1711_v3  ;;  %1630 = vst [vmem:[#allocation7] sm:$0x1] %v1629_v12 }
 0x310   : > { %v1734_v21 = vld [vmem:[#allocation7 + $0x1] sm:$0x1]  ;;  %v1654_v24 = vld [vmem:[#allocation7] sm:$0x1] }
 0x33a   : > { %v1864_v13 = vpop.permute.xlu1 %1863  ;;  %v1786_v15 = vpop.permute.xlu0 %1785 }
 0x33b   : > { %v1867_v17 = vsel %vm3671_vm2, %v1864_v13, %v1866_v29  ;;  %v1789_v18 = vsel %vm3671_vm2, %v1786_v15, %v1788_v14 }
 0x33c   : > { %1868 = vst [vmem:[#allocation7 + $0x3] sm:$0x1] %v1867_v17  ;;  %1790 = vst [vmem:[#allocation7 + $0x2] sm:$0x1] %v1789_v18 }
 0x33e   : > { %v1732_v20 = vpop.permute.xlu1 %1731  ;;  %v1650_v23 = vpop.permute.xlu0 %1649 }
 0x33f   : > { %v1735_v25 = vsel %vm3684_vm4, %v1732_v20, %v1734_v21  ;;  %v1655_v26 = vsel %vm3684_vm4, %v1650_v23, %v1654_v24 }
 0x340   : > { %1736 = vst [vmem:[#allocation7 + $0x1] sm:$0x1] %v1735_v25  ;;  %1656 = vst [vmem:[#allocation7] sm:$0x1] %v1655_v26 }
 0x342   : > { %v1888_v27 = vpop.permute.xlu1 %1887  ;;  %v1810_v30 = vpop.permute.xlu0 %1809 }
 0x343   : > { %v1890_v28 = vld [vmem:[#allocation7 + $0x3] sm:$0x1]  ;;  %v1812_v32 = vld [vmem:[#allocation7 + $0x2] sm:$0x1] }
 0x344   : > { %v1891_v33 = vsel %vm3684_vm4, %v1888_v27, %v1890_v28  ;;  %v1813_v34 = vsel %vm3684_vm4, %v1810_v30, %v1812_v32 }
 0x345   : > { %1892 = vst [vmem:[#allocation7 + $0x3] sm:$0x1] %v1891_v33  ;;  %1814 = vst [vmem:[#allocation7 + $0x2] sm:$0x1] %v1813_v34 }
 0x346   : > { %v1756_v36 = vpop.permute.xlu1 %1755  ;;  %v1676_v37 = vpop.permute.xlu0 %1675 }
 0x347   : > { %v1758_v38 = vld [vmem:[#allocation7 + $0x1] sm:$0x1]  ;;  %v1680_v39 = vld [vmem:[#allocation7] sm:$0x1] }
 0x348   : > { %v1759_v40 = vsel %vm3697_vm6, %v1756_v36, %v1758_v38  ;;  %v1681_v31 = vsel %vm3697_vm6, %v1676_v37, %v1680_v39 }
 0x349   : > { %1760 = vst [vmem:[#allocation7 + $0x1] sm:$0x1] %v1759_v40  ;;  %1682 = vst [vmem:[#allocation7] sm:$0x1] %v1681_v31 }
 0x34a   : > { %v1912_v42 = vpop.permute.xlu1 %1911  ;;  %v1834_v44 = vpop.permute.xlu0 %1833 }
 0x34c   : > { %v1914_v41 = vld [vmem:[#allocation7 + $0x3] sm:$0x1]  ;;  %v1836_v43 = vld [vmem:[#allocation7 + $0x2] sm:$0x1] }
 0x34d   : > { %v1915_v45 = vsel %vm3697_vm6, %v1912_v42, %v1914_v41  ;;  %v1837_v46 = vsel %vm3697_vm6, %v1834_v44, %v1836_v43 }
 0x34e   : > { %1916 = vst [vmem:[#allocation7 + $0x3] sm:$0x1] %v1915_v45  ;;  %1838 = vst [vmem:[#allocation7 + $0x2] sm:$0x1] %v1837_v46 }
 0x355   : > { %v2607_v47 = vld.sshfl [vmem:[#allocation7] sm:$0x33 pattern:$0x75316420] }
 0x356   : > { %v1991_v49 = vcombine.high %v2607_v47, %v2607_v47  ;;  %v1998_v51 = vrot.slane %v2607_v47, %v3529_v16 }
 0x358   : > { %v2005_v52 = vrot.slane %v1991_v49, %v3529_v16  ;;  %v2006_v54 = vcombine.high %v1998_v51, %v1998_v51  ;;  %v2973_v16 = vld [vmem:[%s3790_s7 + $0x28] sm:$0xff]  }
 0x35a   : > { %2236 = vmatprep.mubr.bf16.mxu1 %v2005_v52  ;;  %v2007_v53 = vcombine.high %v2005_v52, %v2005_v52 }
 0x35b   : > { %2237 = vmatmul.mubr.bf16.vlgmr.msra.gmra.mxu1 %v1998_v51 }
 0x35c   : > { %2276 = vmatprep.mubr.bf16.mxu0 %v2007_v53  ;;  %2832 = vmatpush3.bf16.msra.mxu1 %v2971_v48 }
 0x35d   : > { %2277 = vmatmul.mubr.bf16.vlgmr.msra.gmra.mxu0 %v2006_v54  ;;  %2833 = vmatprep.subr.bf16.mxu1 %v3046_v22 }
 0x35e   : > { %2847 = vmatprep.mubr.msk.bf16.mxu1 %vm3056_vm7, %v3046_v22 }
 0x360   : > { %2834 = vmatpush3.bf16.msra.mxu1 %v2972_v55 }
 0x361   : > { %2835 = vmatprep.subr.bf16.mxu1 %v3046_v22 }
 0x364   : > { %2836 = vmatpush3.bf16.msra.mxu1 %v2973_v16 }
 0x365   : > { %2837 = vmatprep.subr.bf16.mxu1 %v3046_v22 }
 0x368   : > { %2838 = vmatpush3.bf16.msra.mxu1 %v2974_v56 }
 0x369   : > { %2839 = vmatprep.subr.bf16.mxu1 %v3046_v22 }
 0x36c   : > { %2840 = vmatpush3.bf16.msra.mxu1 %v2975_v57 }
 0x36d   : > { %2841 = vmatprep.subr.bf16.mxu1 %v3046_v22 }
 0x370   : > { %2842 = vmatpush3.bf16.msra.mxu1 %v2976_v58 }
 0x371   : > { %2843 = vmatprep.subr.bf16.mxu1 %v3046_v22 }
 0x374   : > { %2844 = vmatpush3.bf16.msra.mxu1 %v2977_v59 }
 0x375   : > { %2845 = vmatprep.subr.bf16.mxu1 %v3046_v22  ;;  %v2302_v22 = vld [vmem:[%s3791_s8] sm:$0x1] }
 0x378   : > { %2846 = vmatpush3.bf16.msra.mxu1 %v2978_v60 }
 0x41b   : > { %v2758_v61 = vpop.f32.mrf.mxu1 }
 0x41d   : > { %v2759_v63 = vpop.f32.mrf.mxu1  ;;  %v2780_v50 = vpop.f32.mrf.mxu0 }
 0x41e   : > { %v2760_v0 = vadd.f32 %v2759_v63, %v2758_v61 }
 0x41f   : > { %v2761_v1 = vpop.f32.mrf.mxu1  ;;  %v2781_v2 = vpop.f32.mrf.mxu0 }
 0x420   : > { %v2239_v4 = vadd.f32 %v2760_v0, %v1982_v62  ;;  %v2782_v5 = vadd.f32 %v2781_v2, %v2780_v50 }
 0x421   : > { %v2762_v6 = vpop.f32.mrf.mxu1  ;;  %v2783_v7 = vpop.f32.mrf.mxu0 }
 0x422   : > { %v2279_v8 = vadd.f32 %v2782_v5, %v2239_v4 }
 0x423   : > { %v2784_v9 = vpop.f32.mrf.mxu0 }
 0x424   : > { %v2284_v10 = vmax.f32 %v2279_v8, 0.0 }
 0x426   : > { %v2285_v11 = vpack.c.bf16 %v2284_v10, %v2284_v10 }
 0x428   : > { %2848 = vmatmul.mubr.bf16.vlgmr.msra.gmra.mxu1 %v2285_v11 }
 0x4e8   : > { %v2385_v3 = vpop.f32.mrf.mxu1 }
 0x4e9   : > { %v2386_v12 = vadd.f32 %v2385_v3, %v2302_v22 }
 0x4ea   : > { %v2849_v29 = vpop.f32.mrf.mxu1 }
 0x4eb   : > { %v2392_v13 = vsel %vm2391_vm8, %v2386_v12, -inf }
 0x4ec   : > { %2393 = vmax.xlane.f32.xlu0 %v2392_v13  ;;  %v2388_v14 = vpop.f32.mrf.mxu1 }
 0x4ee   : > { %v2850_v15 = vpop.f32.mrf.mxu1 }
 0x575   : > { %v2394_v17 = vpop.xlane.xlu0 %2393 }
 0x576   : > { %v2395_v18 = vsub.f32 %v2386_v12, %v2394_v17 }
 0x578   : > { %v2396_v19 = vmul.f32 1.442695, %v2395_v18 }
 0x57a   : > { %2979 = vpow2.f32 %v2396_v19 }
 0x587   : > { %v2980_v20 = vpop.eup %2979 }
 0x588   : > { %v2398_v21 = vsel %vm2391_vm8, %v2980_v20, 0.0 }
 0x589   : > { %2399 = vadd.xlane.f32.xlu1 %v2398_v21 }
 0x612   : > { %v2400_v23 = vpop.xlane.xlu1 %2399 }
 0x613   : > { %2981 = vrcp.f32 %v2400_v23 }
 0x620   : > { %v2982_v24 = vpop.eup %2981 }
 0x621   : > { %v2402_v25 = vmul.f32 %v2982_v24, %v2980_v20 }
 0x623   : > { %2403 = vst [vmem:[%s324_s29] sm:$0x1] %v2402_v25 }
 0x624   : > { %2996 = shalt.err (!%p2993_p3)
}
 0x625   : > { %s2997_s28 = scalar_lea.hbm %s2415_s22, 16  ;;  %s3001_s29 = scalar_lea.hbm %s3792_s9, 32 }
 0x626   : > { %p2998_p4 = scmp.ne.s32.totalorder %s2415_s22, %s2997_s28  ;;  %p3002_p9 = scmp.lt.s32.totalorder %s2415_s22, %s3792_s9 }
 0x627   : > { %p3003_p10 = scmp.lt.s32.totalorder %s3001_s29, %s2997_s28 }
 0x628   : > { %p2999_p7 = pnand %p2998_p4, %p3146_p5 }
 0x629   : > { %p3004_p11 = por %p3003_p10, %p3002_p9 }
 0x62a   : > { %p3000_p8 = pneg %p2999_p7 }
 0x62c   : > { %p3005_p12 = pnand %p3004_p11, %p3000_p8 }
 0x62e   : > { %3008 = shalt.err (!%p3005_p12)
}
 0x62f   : > { %2851 = dma.vmem_to_hbm [thread:$0]  (%p3146_p5), %s2418_s21, 16, %s2415_s22, %s2405_s17  }
 0x630 PF: > { %p2857_p13 = scmp.ge.s32.totalorder %s3043_s12, 2  ;;  %s2429_s23 = sand.u32 1, %s3031_s30  }
 0x631   : > { %s2430_s25 = scalar_lea.sflag [#allocation9], %s2429_s23 }
 0x632   : > { %p2854_p0 = pnand %p2857_p13, %p3150_p6 }
 0x634   : > { %p2855_p1 = pneg %p2854_p0 }
 0x636   : > { %3026 = dma.done.wait (%p2855_p1), %s2430_s25, 16  }
 0x637   : > { %3028 = vsyncadd (%p2855_p1), %s2430_s25, 4294967280  ;;  %p19_p2 = scmp.ge.s32.totalorder %s3133_s15, 4   ;;  %s3806_s30 = smov %s3035_s10 }
 0x638   : > { %s3807_s10 = smov %s3039_s11  ;;  %s3808_s11 = smov %s3144_s18 }
 0x639   : > { %s3809_s12 = smov %s3133_s15  ;;  %21 = sbr.rel (!%p19_p2) target bundleno = 3 (0x3), region = 126 }
 0x63e   :  { %2434 = vsyncpa [#allocation9], 1 }
 0x63f   :  { %2436 = vsyncpa [#allocation9 + $0x1], 1 }

</bundles_post_ra>
